<compile_context>
chip_gen: v6e
topology: v6e:2x2x1
jax: 0.10.0
libtpu: 0.0.40
codegen_flags: <defaults>
</compile_context>

<pallas_src>
import jax
import jax.numpy as jnp
from jax import lax
from jax.experimental import pallas as pl
from jax.experimental.pallas import tpu as pltpu


def _round_up(a, b):
    return -(-a // b) * b


def history_encoder_kernel(sched_ref,      # SMEM prefetch [2]: (max_len, last_time_block)
                           len_ref,        # [BB, 1] int32 lengths
                           x_ref,          # [TT, BB, D] time-major input block
                           wih0_ref,       # [D, 4H]  layer-0 input weights (f32)
                           b0_ref,         # [1, 4H]  layer-0 bias (f32)
                           wf_ref,         # [2H, 8H] fused recurrent weights (bf16/f32)
                           b1_ref,         # [1, 4H]  layer-1 bias (f32)
                           out_ref,        # [BB, H]  hidden[-1]
                           gx_sc,          # [TT, BB, 4H] f32 scratch: layer-0 input gates
                           h0_s, c0_s, h1_s, c1_s):   # [BB, H] f32 state scratch
    tb = pl.program_id(1)
    TT, BB, D = x_ref.shape
    H = h0_s.shape[1]
    G = 4 * H
    t0 = tb * TT

    def act(gates, c_prev):
        # gate order (i, f, o, g): one contiguous sigmoid stream + one tanh.
        sig = jax.nn.sigmoid(gates[:, :3 * H])
        gi = sig[:, 0:H]
        gf = sig[:, H:2 * H]
        go = sig[:, 2 * H:3 * H]
        gg = jnp.tanh(gates[:, 3 * H:])
        c_new = gf * c_prev + gi * gg
        h_new = go * jnp.tanh(c_new)
        return h_new, c_new

    @pl.when(tb == 0)
    def _():
        h0_s[...] = jnp.zeros_like(h0_s)
        c0_s[...] = jnp.zeros_like(c0_s)
        h1_s[...] = jnp.zeros_like(h1_s)
        c1_s[...] = jnp.zeros_like(c1_s)

    # Skip compute for fully padded time blocks (their input DMA is also
    # avoided by the clamped x BlockSpec index_map).
    @pl.when(t0 < sched_ref[0])
    def _():
        lens = len_ref[...]                               # [BB, 1] int32
        rem = lens - t0                                   # hoisted: active iff k < rem
        wf = wf_ref[...]                                  # [2H, 8H], hoisted load
        cdt = wf.dtype
        b1b = jnp.broadcast_to(b1_ref[...], (BB, G))      # hoisted bias broadcast

        # ---- block prologue: layer-0 input projection, ONE GEMM per block ----
        xb = x_ref[...].reshape(TT * BB, D)
        gx = jnp.dot(xb, wih0_ref[...], preferred_element_type=jnp.float32)
        gx = gx + b0_ref[...]
        gx_sc[...] = gx.reshape(TT, BB, G)

        # ---- wavefront recurrence: layer 1 runs one step behind layer 0 ----
        def step(k, carry):
            # h0,c0 hold layer-0 state @ t0+k-1 ; h1,c1 hold layer-1 state @ t0+k-2
            h0, c0, h1, c1 = carry
            xh = jnp.concatenate([h0, h1], axis=1).astype(cdt)
            fused = jnp.dot(xh, wf, preferred_element_type=jnp.float32)

            # layer 1, timestep t0+k-1
            m1 = jnp.broadcast_to(
                jnp.logical_and(k - 1 < rem, t0 + k >= 1), (BB, H))
            h1n, c1n = act(fused[:, G:] + b1b, c1)
            h1 = jnp.where(m1, h1n, h1)
            c1 = jnp.where(m1, c1n, c1)

            # layer 0, timestep t0+k
            m0 = jnp.broadcast_to(k < rem, (BB, H))
            h0n, c0n = act(gx_sc[k] + fused[:, :G], c0)
            h0 = jnp.where(m0, h0n, h0)
            c0 = jnp.where(m0, c0n, c0)
            return h0, c0, h1, c1

        h0, c0, h1, c1 = lax.fori_loop(
            0, TT, step,
            (h0_s[...], c0_s[...], h1_s[...], c1_s[...]),
            unroll=min(8, TT))

        # states persist across time blocks via scratch (one write per block)
        h0_s[...] = h0
        c0_s[...] = c0
        h1_s[...] = h1
        c1_s[...] = c1

    @pl.when(tb == pl.num_programs(1) - 1)
    def _():
        # Wavefront epilogue: rows whose last valid timestep was the final
        # processed layer-0 step still owe one layer-1 update (layer 1 lags).
        lens = len_ref[...]
        t_last = sched_ref[1] * TT + (TT - 1)             # last processed layer-0 step
        m_epi = jnp.broadcast_to(
            jnp.logical_and(lens > t_last, lens > 0), (BB, H))
        wf1 = wf_ref[:, G:]                               # [2H, 4H] layer-1 slice
        xh = jnp.concatenate([h0_s[...], h1_s[...]], axis=1).astype(wf1.dtype)
        g1 = jnp.dot(xh, wf1, preferred_element_type=jnp.float32) + b1_ref[...]
        h1n, _ = act(g1, c1_s[...])
        out_ref[...] = jnp.where(m_epi, h1n, h1_s[...])   # == hidden[-1] of nn.LSTM


def history_encoder_forward(x, lengths, params, *, compute_dtype=jnp.bfloat16,
                            tt=None):
    """x: [B, T, D] float32 (batch_first, like PyTorch); lengths: [B] int."""
    B, T, D = x.shape
    H = params["whh0"].shape[1]
    G = 4 * H

    # ---- generation-aware tiling ----
    kind = jax.devices()[0].device_kind.lower()
    two_tc = "v7" in kind             # v7x: 2 TensorCores -> want >=2 batch blocks
    vmem_limit = (40 if two_tc else 64) * 1024 * 1024
    vmem_budget = (32 if two_tc else 56) * 1024 * 1024

    BP = _round_up(B, 8)
    if two_tc and BP >= 16:
        BB = min(_round_up(-(-BP // 2), 8), 256)   # >=2 blocks to feed both cores
    else:
        BB = min(BP, 512)                          # single core: one big block
    BP = _round_up(BP, BB)

    if tt is None:
        tt = 32 if two_tc else 64
    TT = max(1, min(tt, _round_up(T, 8)))

    def vmem_est(tt_, bb_):
        return (2 * tt_ * bb_ * D * 4              # double-buffered x block
                + tt_ * bb_ * G * 4                # gx scratch
                + 4 * bb_ * H * 4                  # state scratch
                + (D * G + 2 * H * 2 * G + 2 * G) * 4
                + 2 * bb_ * H * 4)

    while TT > 8 and vmem_est(TT, BB) > vmem_budget:
        TT //= 2
    TP = _round_up(T, TT)

    # ---- inputs: zero-padded, time-major ----
    lengths = jnp.asarray(lengths, jnp.int32)
    len_pad = jnp.zeros((BP,), jnp.int32).at[:B].set(lengths).reshape(BP, 1)
    max_len = jnp.max(lengths).astype(jnp.int32)
    last_blk = jnp.maximum(max_len - 1, 0) // TT
    sched = jnp.stack([max_len, last_blk]).astype(jnp.int32)    # scalar prefetch

    x_tm = jnp.zeros((TP, BP, D), jnp.float32)
    x_tm = x_tm.at[:T, :B].set(jnp.transpose(x.astype(jnp.float32), (1, 0, 2)))

    # ---- weights: transpose to [in, 4H], gate order (i,f,g,o) -> (i,f,o,g) ----
    def reorder(w):
        return jnp.concatenate(
            [w[..., 0:H], w[..., H:2 * H], w[..., 3 * H:4 * H], w[..., 2 * H:3 * H]],
            axis=-1)

    wih0 = reorder(params["wih0"].T).astype(jnp.float32)                     # [D, 4H]
    whh0 = reorder(params["whh0"].T).astype(jnp.float32)                     # [H, 4H]
    b0 = reorder((params["bih0"] + params["bhh0"]).reshape(1, G)).astype(jnp.float32)
    wih1 = reorder(params["wih1"].T).astype(jnp.float32)                     # [H, 4H]
    whh1 = reorder(params["whh1"].T).astype(jnp.float32)                     # [H, 4H]
    b1 = reorder((params["bih1"] + params["bhh1"]).reshape(1, G)).astype(jnp.float32)

    # Wavefront-fused recurrent weight:  [h0 | h1] @ [[Whh0, Wih1], [0, Whh1]]
    wf = jnp.concatenate(
        [jnp.concatenate([whh0, wih1], axis=1),
         jnp.concatenate([jnp.zeros((H, G), jnp.float32), whh1], axis=1)],
        axis=0).astype(compute_dtype)                                        # [2H, 8H]

    grid = (BP // BB, TP // TT)   # (batch blocks: parallel, time blocks: sequential)

    def _bcast(bb, tb, s):
        return (0, 0)

    def _x_map(bb, tb, s):
        # clamp the time-block index so fully padded blocks are not re-DMA'd
        return (jnp.minimum(tb, s[1]), bb, 0)

    grid_spec = pltpu.PrefetchScalarGridSpec(
        num_scalar_prefetch=1,
        grid=grid,
        in_specs=[
            pl.BlockSpec((BB, 1), lambda bb, tb, s: (bb, 0)),     # lengths
            pl.BlockSpec((TT, BB, D), _x_map),                    # x block (time-major)
            pl.BlockSpec((D, G), _bcast),                         # W_ih layer 0
            pl.BlockSpec((1, G), _bcast),                         # bias layer 0
            pl.BlockSpec((2 * H, 2 * G), _bcast),                 # fused recurrent W
            pl.BlockSpec((1, G), _bcast),                         # bias layer 1
        ],
        out_specs=pl.BlockSpec((BB, H), lambda bb, tb, s: (bb, 0)),
        scratch_shapes=[
            pltpu.VMEM((TT, BB, G), jnp.float32),                 # per-block input gates
            pltpu.VMEM((BB, H), jnp.float32),                     # h0
            pltpu.VMEM((BB, H), jnp.float32),                     # c0
            pltpu.VMEM((BB, H), jnp.float32),                     # h1
            pltpu.VMEM((BB, H), jnp.float32),                     # c1
        ],
    )

    out = pl.pallas_call(
        history_encoder_kernel,
        out_shape=jax.ShapeDtypeStruct((BP, H), jnp.float32),
        grid_spec=grid_spec,
        compiler_params=pltpu.CompilerParams(
            dimension_semantics=("parallel", "arbitrary"),
            vmem_limit_bytes=vmem_limit),
    )(sched, len_pad, x_tm, wih0, b0, wf, b1)

    return out[:B]


def history_encoder_reference(x, lengths, params):
    """Pure-JAX reference reproducing packed 2-layer LSTM semantics (torch gate order)."""
    B, T, D = x.shape
    H = params["whh0"].shape[1]

    def cell(x_t, h, c, wih, whh, bih, bhh):
        gates = x_t @ wih.T + h @ whh.T + bih + bhh
        i = jax.nn.sigmoid(gates[:, :H])
        f = jax.nn.sigmoid(gates[:, H:2 * H])
        g = jnp.tanh(gates[:, 2 * H:3 * H])
        o = jax.nn.sigmoid(gates[:, 3 * H:])
        c_new = f * c + i * g
        return o * jnp.tanh(c_new), c_new

    h0 = c0 = h1 = c1 = jnp.zeros((B, H), jnp.float32)
    for t in range(T):
        m = (t < lengths).reshape(B, 1)
        h0n, c0n = cell(x[:, t], h0, c0, params["wih0"], params["whh0"],
                        params["bih0"], params["bhh0"])
        h0 = jnp.where(m, h0n, h0)
        c0 = jnp.where(m, c0n, c0)
        h1n, c1n = cell(h0, h1, c1, params["wih1"], params["whh1"],
                        params["bih1"], params["bhh1"])
        h1 = jnp.where(m, h1n, h1)
        c1 = jnp.where(m, c1n, c1)
    return h1


if __name__ == "__main__":
    B, T, D, H = 2, 8, 16, 32

    key = jax.random.PRNGKey(0)
    kx, kp, kx2 = jax.random.split(key, 3)

    x = jax.random.normal(kx, (B, T, D), dtype=jnp.float32)
    lengths = jnp.array([5, 8], dtype=jnp.int32)

    # deterministic parameters, PyTorch-style uniform(-1/sqrt(H), 1/sqrt(H))
    bound = 1.0 / (H ** 0.5)
    keys = jax.random.split(kp, 8)

    def u(k, shape):
        return jax.random.uniform(k, shape, jnp.float32, -bound, bound)

    params = dict(
        wih0=u(keys[0], (4 * H, D)),
        whh0=u(keys[1], (4 * H, H)),
        bih0=u(keys[2], (4 * H,)),
        bhh0=u(keys[3], (4 * H,)),
        wih1=u(keys[4], (4 * H, H)),
        whh1=u(keys[5], (4 * H, H)),
        bih1=u(keys[6], (4 * H,)),
        bhh1=u(keys[7], (4 * H,)),
    )

    # ---- test 1: exact (f32) and perf (bf16) configurations, single time block ----
    ref = history_encoder_reference(x, lengths, params)

    out_f32 = jax.block_until_ready(
        history_encoder_forward(x, lengths, params, compute_dtype=jnp.float32))
    assert out_f32.shape == (B, H)
    assert jnp.allclose(out_f32, ref, atol=1e-3, rtol=1e-3), (
        f"f32 max abs err {float(jnp.max(jnp.abs(out_f32 - ref)))}")

    out_bf16 = jax.block_until_ready(history_encoder_forward(x, lengths, params))
    # bf16 recurrent matmuls (f32 accumulation) are a deliberate precision trade
    assert jnp.allclose(out_bf16, ref, atol=2e-2, rtol=2e-2), (
        f"bf16 max abs err {float(jnp.max(jnp.abs(out_bf16 - ref)))}")

    # ---- test 2: multi time-block path (cross-block wavefront carry, skipped
    #      padded blocks, and the masked layer-1 epilogue) ----
    B2, T2 = 3, 20
    x2 = jax.random.normal(kx2, (B2, T2, D), dtype=jnp.float32)
    lengths2 = jnp.array([16, 7, 3], dtype=jnp.int32)   # max_len on a block boundary
    ref2 = history_encoder_reference(x2, lengths2, params)
    out2 = jax.block_until_ready(
        history_encoder_forward(x2, lengths2, params,
                                compute_dtype=jnp.float32, tt=8))
    assert out2.shape == (B2, H)
    assert jnp.allclose(out2, ref2, atol=1e-3, rtol=1e-3), (
        f"multi-block max abs err {float(jnp.max(jnp.abs(out2 - ref2)))}")

    print("KERNEL_OK")
</pallas_src>

<mosaic_0001>
module attributes {stable_mosaic.version = 11 : i64} {
  func.func @history_encoder_kernel(%arg0: i32, %arg1: i32, %arg2: memref<2xi32, #tpu.memory_space<smem>>, %arg3: memref<8x1xi32, #tpu.memory_space<vmem>>, %arg4: memref<8x8x16xf32, #tpu.memory_space<vmem>>, %arg5: memref<16x128xf32, #tpu.memory_space<vmem>>, %arg6: memref<1x128xf32, #tpu.memory_space<vmem>>, %arg7: memref<64x256xf32, #tpu.memory_space<vmem>>, %arg8: memref<1x128xf32, #tpu.memory_space<vmem>>, %arg9: memref<8x32xf32, #tpu.memory_space<vmem>>, %arg10: memref<8x8x128xf32, #tpu.memory_space<vmem>>, %arg11: memref<8x32xf32, #tpu.memory_space<vmem>>, %arg12: memref<8x32xf32, #tpu.memory_space<vmem>>, %arg13: memref<8x32xf32, #tpu.memory_space<vmem>>, %arg14: memref<8x32xf32, #tpu.memory_space<vmem>>) attributes {dimension_semantics = [#tpu.dimension_semantics<parallel>, #tpu.dimension_semantics<arbitrary>], iteration_bounds = array<i64: 1, 1>, scalar_prefetch = 1 : i64, scratch_operands = 5 : i64, tpu.core_type = #tpu.core_type<tc>, window_params = [{transform_indices = @transform_0, window_bounds = array<i64: 8, 1>}, {transform_indices = @transform_1, window_bounds = array<i64: 8, 8, 16>}, {pipeline_mode = #tpu.pipeline_mode<synchronous>, transform_indices = @transform_2, window_bounds = array<i64: 16, 128>}, {pipeline_mode = #tpu.pipeline_mode<synchronous>, transform_indices = @transform_3, window_bounds = array<i64: 1, 128>}, {pipeline_mode = #tpu.pipeline_mode<synchronous>, transform_indices = @transform_4, window_bounds = array<i64: 64, 256>}, {pipeline_mode = #tpu.pipeline_mode<synchronous>, transform_indices = @transform_5, window_bounds = array<i64: 1, 128>}, {transform_indices = @transform_6, window_bounds = array<i64: 8, 32>}]} {
    %c8_i32 = arith.constant 8 : i32
    %0 = arith.muli %arg1, %c8_i32 : i32
    %c0_i32 = arith.constant 0 : i32
    %1 = arith.cmpi eq, %arg1, %c0_i32 : i32
    %2 = arith.extui %1 : i1 to i32
    %c0_i32_0 = arith.constant 0 : i32
    %3 = arith.cmpi ne, %2, %c0_i32_0 : i32
    scf.if %3 {
      %cst = arith.constant 0.000000e+00 : f32
      %11 = vector.broadcast %cst : f32 to vector<8x32xf32>
      %c0_4 = arith.constant 0 : index
      %c0_5 = arith.constant 0 : index
      %12 = vector.load %arg11[%c0_4, %c0_5] : memref<8x32xf32, #tpu.memory_space<vmem>>, vector<8x32xf32>
      tpu.vector_store %arg11[%c0_4, %c0_5], %11 {strides = array<i32>} : memref<8x32xf32, #tpu.memory_space<vmem>>, vector<8x32xf32>,
      %cst_6 = arith.constant 0.000000e+00 : f32
      %13 = vector.broadcast %cst_6 : f32 to vector<8x32xf32>
      %c0_7 = arith.constant 0 : index
      %c0_8 = arith.constant 0 : index
      %14 = vector.load %arg12[%c0_7, %c0_8] : memref<8x32xf32, #tpu.memory_space<vmem>>, vector<8x32xf32>
      tpu.vector_store %arg12[%c0_7, %c0_8], %13 {strides = array<i32>} : memref<8x32xf32, #tpu.memory_space<vmem>>, vector<8x32xf32>,
      %cst_9 = arith.constant 0.000000e+00 : f32
      %15 = vector.broadcast %cst_9 : f32 to vector<8x32xf32>
      %c0_10 = arith.constant 0 : index
      %c0_11 = arith.constant 0 : index
      %16 = vector.load %arg13[%c0_10, %c0_11] : memref<8x32xf32, #tpu.memory_space<vmem>>, vector<8x32xf32>
      tpu.vector_store %arg13[%c0_10, %c0_11], %15 {strides = array<i32>} : memref<8x32xf32, #tpu.memory_space<vmem>>, vector<8x32xf32>,
      %cst_12 = arith.constant 0.000000e+00 : f32
      %17 = vector.broadcast %cst_12 : f32 to vector<8x32xf32>
      %c0_13 = arith.constant 0 : index
      %c0_14 = arith.constant 0 : index
      %18 = vector.load %arg14[%c0_13, %c0_14] : memref<8x32xf32, #tpu.memory_space<vmem>>, vector<8x32xf32>
      tpu.vector_store %arg14[%c0_13, %c0_14], %17 {strides = array<i32>} : memref<8x32xf32, #tpu.memory_space<vmem>>, vector<8x32xf32>,
    } else {
    }
    %c0 = arith.constant 0 : index
    %4 = memref.load %arg2[%c0] : memref<2xi32, #tpu.memory_space<smem>>
    %5 = arith.cmpi slt, %0, %4 : i32
    %6 = arith.extui %5 : i1 to i32
    %c0_i32_1 = arith.constant 0 : i32
    %7 = arith.cmpi ne, %6, %c0_i32_1 : i32
    scf.if %7 {
      %c0_4 = arith.constant 0 : index
      %c0_5 = arith.constant 0 : index
      %11 = vector.load %arg3[%c0_4, %c0_5] : memref<8x1xi32, #tpu.memory_space<vmem>>, vector<8x1xi32>
      %12 = vector.broadcast %0 : i32 to vector<8x1xi32>
      %13 = arith.subi %11, %12 : vector<8x1xi32>
      %c0_6 = arith.constant 0 : index
      %c0_7 = arith.constant 0 : index
      %14 = vector.load %arg7[%c0_6, %c0_7] : memref<64x256xf32, #tpu.memory_space<vmem>>, vector<64x256xf32>
      %c0_8 = arith.constant 0 : index
      %c0_9 = arith.constant 0 : index
      %15 = vector.load %arg8[%c0_8, %c0_9] : memref<1x128xf32, #tpu.memory_space<vmem>>, vector<1x128xf32>
      %16 = vector.shape_cast %15 : vector<1x128xf32> to vector<1x128xf32>
      %17 = vector.broadcast %16 : vector<1x128xf32> to vector<8x128xf32>
      %c0_10 = arith.constant 0 : index
      %c0_11 = arith.constant 0 : index
      %c0_12 = arith.constant 0 : index
      %18 = vector.load %arg4[%c0_10, %c0_11, %c0_12] : memref<8x8x16xf32, #tpu.memory_space<vmem>>, vector<8x8x16xf32>
      %19 = vector.shape_cast %18 : vector<8x8x16xf32> to vector<64x16xf32>
      %c0_13 = arith.constant 0 : index
      %c0_14 = arith.constant 0 : index
      %20 = vector.load %arg5[%c0_13, %c0_14] : memref<16x128xf32, #tpu.memory_space<vmem>>, vector<16x128xf32>
      %cst = arith.constant dense<0.000000e+00> : vector<64x128xf32>
      %21 = tpu.matmul %19, %20, %cst {dimension_numbers = #tpu.dot_dimension_numbers<[1], [0], [0], [1], [0, 0, 1, 1], [], []>} : vector<64x16xf32>, vector<16x128xf32>, vector<64x128xf32> -> vector<64x128xf32>
      %c0_15 = arith.constant 0 : index
      %c0_16 = arith.constant 0 : index
      %22 = vector.load %arg6[%c0_15, %c0_16] : memref<1x128xf32, #tpu.memory_space<vmem>>, vector<1x128xf32>
      %23 = vector.broadcast %22 : vector<1x128xf32> to vector<64x128xf32>
      %24 = arith.addf %21, %23 : vector<64x128xf32>
      %25 = vector.shape_cast %24 : vector<64x128xf32> to vector<8x8x128xf32>
      %c0_17 = arith.constant 0 : index
      %c0_18 = arith.constant 0 : index
      %c0_19 = arith.constant 0 : index
      %26 = vector.load %arg10[%c0_17, %c0_18, %c0_19] : memref<8x8x128xf32, #tpu.memory_space<vmem>>, vector<8x8x128xf32>
      tpu.vector_store %arg10[%c0_17, %c0_18, %c0_19], %25 {strides = array<i32>} : memref<8x8x128xf32, #tpu.memory_space<vmem>>, vector<8x8x128xf32>,
      %c0_20 = arith.constant 0 : index
      %c0_21 = arith.constant 0 : index
      %27 = vector.load %arg11[%c0_20, %c0_21] : memref<8x32xf32, #tpu.memory_space<vmem>>, vector<8x32xf32>
      %c0_22 = arith.constant 0 : index
      %c0_23 = arith.constant 0 : index
      %28 = vector.load %arg12[%c0_22, %c0_23] : memref<8x32xf32, #tpu.memory_space<vmem>>, vector<8x32xf32>
      %c0_24 = arith.constant 0 : index
      %c0_25 = arith.constant 0 : index
      %29 = vector.load %arg13[%c0_24, %c0_25] : memref<8x32xf32, #tpu.memory_space<vmem>>, vector<8x32xf32>
      %c0_26 = arith.constant 0 : index
      %c0_27 = arith.constant 0 : index
      %30 = vector.load %arg14[%c0_26, %c0_27] : memref<8x32xf32, #tpu.memory_space<vmem>>, vector<8x32xf32>
      %c0_i32_28 = arith.constant 0 : i32
      %31 = tpu.concatenate %27, %29 in 1 : vector<8x32xf32>, vector<8x32xf32> -> vector<8x64xf32>
      %cst_29 = arith.constant dense<0.000000e+00> : vector<8x256xf32>
      %32 = tpu.matmul %31, %14, %cst_29 {dimension_numbers = #tpu.dot_dimension_numbers<[1], [0], [0], [1], [0, 0, 1, 1], [], []>} : vector<8x64xf32>, vector<64x256xf32>, vector<8x256xf32> -> vector<8x256xf32>
      %c1_i32 = arith.constant 1 : i32
      %33 = arith.subi %c0_i32_28, %c1_i32 : i32
      %34 = vector.broadcast %33 : i32 to vector<8x1xi32>
      %35 = arith.cmpi slt, %34, %13 : vector<8x1xi32>
      %36 = arith.addi %0, %c0_i32_28 : i32
      %c1_i32_30 = arith.constant 1 : i32
      %37 = arith.cmpi sge, %36, %c1_i32_30 : i32
      %38 = vector.broadcast %37 : i1 to vector<8x1xi1>
      %39 = arith.andi %35, %38 : vector<8x1xi1>
      %40 = vector.shape_cast %39 : vector<8x1xi1> to vector<8x1xi1>
      %41 = vector.broadcast %40 : vector<8x1xi1> to vector<8x32xi1>
      %42 = vector.extract_strided_slice %32 {offsets = [0, 128], sizes = [8, 128], strides = [1, 1]} : vector<8x256xf32> to vector<8x128xf32>
      %43 = arith.addf %42, %17 : vector<8x128xf32>
      %44 = vector.extract_strided_slice %43 {offsets = [0, 0], sizes = [8, 96], strides = [1, 1]} : vector<8x128xf32> to vector<8x96xf32>
      %45 = arith.negf %44 : vector<8x96xf32>
      %46 = math.exp %45 : vector<8x96xf32>
      %cst_31 = arith.constant 1.000000e+00 : f32
      %47 = vector.broadcast %cst_31 : f32 to vector<8x96xf32>
      %48 = arith.addf %47, %46 : vector<8x96xf32>
      %49 = arith.divf %47, %48 : vector<8x96xf32>
      %50 = vector.extract_strided_slice %49 {offsets = [0, 0], sizes = [8, 32], strides = [1, 1]} : vector<8x96xf32> to vector<8x32xf32>
      %51 = vector.extract_strided_slice %49 {offsets = [0, 32], sizes = [8, 32], strides = [1, 1]} : vector<8x96xf32> to vector<8x32xf32>
      %52 = vector.extract_strided_slice %49 {offsets = [0, 64], sizes = [8, 32], strides = [1, 1]} : vector<8x96xf32> to vector<8x32xf32>
      %53 = vector.extract_strided_slice %43 {offsets = [0, 96], sizes = [8, 32], strides = [1, 1]} : vector<8x128xf32> to vector<8x32xf32>
      %54 = math.tanh %53 : vector<8x32xf32>
      %55 = arith.mulf %51, %30 : vector<8x32xf32>
      %56 = arith.mulf %50, %54 : vector<8x32xf32>
      %57 = arith.addf %55, %56 : vector<8x32xf32>
      %58 = math.tanh %57 : vector<8x32xf32>
      %59 = arith.mulf %52, %58 : vector<8x32xf32>
      %60 = arith.select %41, %59, %29 : vector<8x32xi1>, vector<8x32xf32>
      %61 = arith.select %41, %57, %30 : vector<8x32xi1>, vector<8x32xf32>
      %62 = vector.broadcast %c0_i32_28 : i32 to vector<8x1xi32>
      %63 = arith.cmpi slt, %62, %13 : vector<8x1xi32>
      %64 = vector.shape_cast %63 : vector<8x1xi1> to vector<8x1xi1>
      %65 = vector.broadcast %64 : vector<8x1xi1> to vector<8x32xi1>
      %66 = arith.index_cast %c0_i32_28 : i32 to index
      %c0_32 = arith.constant 0 : index
      %c0_33 = arith.constant 0 : index
      %67 = vector.load %arg10[%66, %c0_32, %c0_33] : memref<8x8x128xf32, #tpu.memory_space<vmem>>, vector<1x8x128xf32>
      %68 = vector.shape_cast %67 : vector<1x8x128xf32> to vector<8x128xf32>
      %69 = vector.extract_strided_slice %32 {offsets = [0, 0], sizes = [8, 128], strides = [1, 1]} : vector<8x256xf32> to vector<8x128xf32>
      %70 = arith.addf %68, %69 : vector<8x128xf32>
      %71 = vector.extract_strided_slice %70 {offsets = [0, 0], sizes = [8, 96], strides = [1, 1]} : vector<8x128xf32> to vector<8x96xf32>
      %72 = arith.negf %71 : vector<8x96xf32>
      %73 = math.exp %72 : vector<8x96xf32>
      %cst_34 = arith.constant 1.000000e+00 : f32
      %74 = vector.broadcast %cst_34 : f32 to vector<8x96xf32>
      %75 = arith.addf %74, %73 : vector<8x96xf32>
      %76 = arith.divf %74, %75 : vector<8x96xf32>
      %77 = vector.extract_strided_slice %76 {offsets = [0, 0], sizes = [8, 32], strides = [1, 1]} : vector<8x96xf32> to vector<8x32xf32>
      %78 = vector.extract_strided_slice %76 {offsets = [0, 32], sizes = [8, 32], strides = [1, 1]} : vector<8x96xf32> to vector<8x32xf32>
      %79 = vector.extract_strided_slice %76 {offsets = [0, 64], sizes = [8, 32], strides = [1, 1]} : vector<8x96xf32> to vector<8x32xf32>
      %80 = vector.extract_strided_slice %70 {offsets = [0, 96], sizes = [8, 32], strides = [1, 1]} : vector<8x128xf32> to vector<8x32xf32>
      %81 = math.tanh %80 : vector<8x32xf32>
      %82 = arith.mulf %78, %28 : vector<8x32xf32>
      %83 = arith.mulf %77, %81 : vector<8x32xf32>
      %84 = arith.addf %82, %83 : vector<8x32xf32>
      %85 = math.tanh %84 : vector<8x32xf32>
      %86 = arith.mulf %79, %85 : vector<8x32xf32>
      %87 = arith.select %65, %86, %27 : vector<8x32xi1>, vector<8x32xf32>
      %88 = arith.select %65, %84, %28 : vector<8x32xi1>, vector<8x32xf32>
      %c1_i32_35 = arith.constant 1 : i32
      %89 = tpu.concatenate %87, %60 in 1 : vector<8x32xf32>, vector<8x32xf32> -> vector<8x64xf32>
      %cst_36 = arith.constant dense<0.000000e+00> : vector<8x256xf32>
      %90 = tpu.matmul %89, %14, %cst_36 {dimension_numbers = #tpu.dot_dimension_numbers<[1], [0], [0], [1], [0, 0, 1, 1], [], []>} : vector<8x64xf32>, vector<64x256xf32>, vector<8x256xf32> -> vector<8x256xf32>
      %c1_i32_37 = arith.constant 1 : i32
      %91 = arith.subi %c1_i32_35, %c1_i32_37 : i32
      %92 = vector.broadcast %91 : i32 to vector<8x1xi32>
      %93 = arith.cmpi slt, %92, %13 : vector<8x1xi32>
      %94 = arith.addi %0, %c1_i32_35 : i32
      %c1_i32_38 = arith.constant 1 : i32
      %95 = arith.cmpi sge, %94, %c1_i32_38 : i32
      %96 = vector.broadcast %95 : i1 to vector<8x1xi1>
      %97 = arith.andi %93, %96 : vector<8x1xi1>
      %98 = vector.shape_cast %97 : vector<8x1xi1> to vector<8x1xi1>
      %99 = vector.broadcast %98 : vector<8x1xi1> to vector<8x32xi1>
      %100 = vector.extract_strided_slice %90 {offsets = [0, 128], sizes = [8, 128], strides = [1, 1]} : vector<8x256xf32> to vector<8x128xf32>
      %101 = arith.addf %100, %17 : vector<8x128xf32>
      %102 = vector.extract_strided_slice %101 {offsets = [0, 0], sizes = [8, 96], strides = [1, 1]} : vector<8x128xf32> to vector<8x96xf32>
      %103 = arith.negf %102 : vector<8x96xf32>
      %104 = math.exp %103 : vector<8x96xf32>
      %cst_39 = arith.constant 1.000000e+00 : f32
      %105 = vector.broadcast %cst_39 : f32 to vector<8x96xf32>
      %106 = arith.addf %105, %104 : vector<8x96xf32>
      %107 = arith.divf %105, %106 : vector<8x96xf32>
      %108 = vector.extract_strided_slice %107 {offsets = [0, 0], sizes = [8, 32], strides = [1, 1]} : vector<8x96xf32> to vector<8x32xf32>
      %109 = vector.extract_strided_slice %107 {offsets = [0, 32], sizes = [8, 32], strides = [1, 1]} : vector<8x96xf32> to vector<8x32xf32>
      %110 = vector.extract_strided_slice %107 {offsets = [0, 64], sizes = [8, 32], strides = [1, 1]} : vector<8x96xf32> to vector<8x32xf32>
      %111 = vector.extract_strided_slice %101 {offsets = [0, 96], sizes = [8, 32], strides = [1, 1]} : vector<8x128xf32> to vector<8x32xf32>
      %112 = math.tanh %111 : vector<8x32xf32>
      %113 = arith.mulf %109, %61 : vector<8x32xf32>
      %114 = arith.mulf %108, %112 : vector<8x32xf32>
      %115 = arith.addf %113, %114 : vector<8x32xf32>
      %116 = math.tanh %115 : vector<8x32xf32>
      %117 = arith.mulf %110, %116 : vector<8x32xf32>
      %118 = arith.select %99, %117, %60 : vector<8x32xi1>, vector<8x32xf32>
      %119 = arith.select %99, %115, %61 : vector<8x32xi1>, vector<8x32xf32>
      %120 = vector.broadcast %c1_i32_35 : i32 to vector<8x1xi32>
      %121 = arith.cmpi slt, %120, %13 : vector<8x1xi32>
      %122 = vector.shape_cast %121 : vector<8x1xi1> to vector<8x1xi1>
      %123 = vector.broadcast %122 : vector<8x1xi1> to vector<8x32xi1>
      %124 = arith.index_cast %c1_i32_35 : i32 to index
      %c0_40 = arith.constant 0 : index
      %c0_41 = arith.constant 0 : index
      %125 = vector.load %arg10[%124, %c0_40, %c0_41] : memref<8x8x128xf32, #tpu.memory_space<vmem>>, vector<1x8x128xf32>
      %126 = vector.shape_cast %125 : vector<1x8x128xf32> to vector<8x128xf32>
      %127 = vector.extract_strided_slice %90 {offsets = [0, 0], sizes = [8, 128], strides = [1, 1]} : vector<8x256xf32> to vector<8x128xf32>
      %128 = arith.addf %126, %127 : vector<8x128xf32>
      %129 = vector.extract_strided_slice %128 {offsets = [0, 0], sizes = [8, 96], strides = [1, 1]} : vector<8x128xf32> to vector<8x96xf32>
      %130 = arith.negf %129 : vector<8x96xf32>
      %131 = math.exp %130 : vector<8x96xf32>
      %cst_42 = arith.constant 1.000000e+00 : f32
      %132 = vector.broadcast %cst_42 : f32 to vector<8x96xf32>
      %133 = arith.addf %132, %131 : vector<8x96xf32>
      %134 = arith.divf %132, %133 : vector<8x96xf32>
      %135 = vector.extract_strided_slice %134 {offsets = [0, 0], sizes = [8, 32], strides = [1, 1]} : vector<8x96xf32> to vector<8x32xf32>
      %136 = vector.extract_strided_slice %134 {offsets = [0, 32], sizes = [8, 32], strides = [1, 1]} : vector<8x96xf32> to vector<8x32xf32>
      %137 = vector.extract_strided_slice %134 {offsets = [0, 64], sizes = [8, 32], strides = [1, 1]} : vector<8x96xf32> to vector<8x32xf32>
      %138 = vector.extract_strided_slice %128 {offsets = [0, 96], sizes = [8, 32], strides = [1, 1]} : vector<8x128xf32> to vector<8x32xf32>
      %139 = math.tanh %138 : vector<8x32xf32>
      %140 = arith.mulf %136, %88 : vector<8x32xf32>
      %141 = arith.mulf %135, %139 : vector<8x32xf32>
      %142 = arith.addf %140, %141 : vector<8x32xf32>
      %143 = math.tanh %142 : vector<8x32xf32>
      %144 = arith.mulf %137, %143 : vector<8x32xf32>
      %145 = arith.select %123, %144, %87 : vector<8x32xi1>, vector<8x32xf32>
      %146 = arith.select %123, %142, %88 : vector<8x32xi1>, vector<8x32xf32>
      %c2_i32 = arith.constant 2 : i32
      %147 = tpu.concatenate %145, %118 in 1 : vector<8x32xf32>, vector<8x32xf32> -> vector<8x64xf32>
      %cst_43 = arith.constant dense<0.000000e+00> : vector<8x256xf32>
      %148 = tpu.matmul %147, %14, %cst_43 {dimension_numbers = #tpu.dot_dimension_numbers<[1], [0], [0], [1], [0, 0, 1, 1], [], []>} : vector<8x64xf32>, vector<64x256xf32>, vector<8x256xf32> -> vector<8x256xf32>
      %c1_i32_44 = arith.constant 1 : i32
      %149 = arith.subi %c2_i32, %c1_i32_44 : i32
      %150 = vector.broadcast %149 : i32 to vector<8x1xi32>
      %151 = arith.cmpi slt, %150, %13 : vector<8x1xi32>
      %152 = arith.addi %0, %c2_i32 : i32
      %c1_i32_45 = arith.constant 1 : i32
      %153 = arith.cmpi sge, %152, %c1_i32_45 : i32
      %154 = vector.broadcast %153 : i1 to vector<8x1xi1>
      %155 = arith.andi %151, %154 : vector<8x1xi1>
      %156 = vector.shape_cast %155 : vector<8x1xi1> to vector<8x1xi1>
      %157 = vector.broadcast %156 : vector<8x1xi1> to vector<8x32xi1>
      %158 = vector.extract_strided_slice %148 {offsets = [0, 128], sizes = [8, 128], strides = [1, 1]} : vector<8x256xf32> to vector<8x128xf32>
      %159 = arith.addf %158, %17 : vector<8x128xf32>
      %160 = vector.extract_strided_slice %159 {offsets = [0, 0], sizes = [8, 96], strides = [1, 1]} : vector<8x128xf32> to vector<8x96xf32>
      %161 = arith.negf %160 : vector<8x96xf32>
      %162 = math.exp %161 : vector<8x96xf32>
      %cst_46 = arith.constant 1.000000e+00 : f32
      %163 = vector.broadcast %cst_46 : f32 to vector<8x96xf32>
      %164 = arith.addf %163, %162 : vector<8x96xf32>
      %165 = arith.divf %163, %164 : vector<8x96xf32>
      %166 = vector.extract_strided_slice %165 {offsets = [0, 0], sizes = [8, 32], strides = [1, 1]} : vector<8x96xf32> to vector<8x32xf32>
      %167 = vector.extract_strided_slice %165 {offsets = [0, 32], sizes = [8, 32], strides = [1, 1]} : vector<8x96xf32> to vector<8x32xf32>
      %168 = vector.extract_strided_slice %165 {offsets = [0, 64], sizes = [8, 32], strides = [1, 1]} : vector<8x96xf32> to vector<8x32xf32>
      %169 = vector.extract_strided_slice %159 {offsets = [0, 96], sizes = [8, 32], strides = [1, 1]} : vector<8x128xf32> to vector<8x32xf32>
      %170 = math.tanh %169 : vector<8x32xf32>
      %171 = arith.mulf %167, %119 : vector<8x32xf32>
      %172 = arith.mulf %166, %170 : vector<8x32xf32>
      %173 = arith.addf %171, %172 : vector<8x32xf32>
      %174 = math.tanh %173 : vector<8x32xf32>
      %175 = arith.mulf %168, %174 : vector<8x32xf32>
      %176 = arith.select %157, %175, %118 : vector<8x32xi1>, vector<8x32xf32>
      %177 = arith.select %157, %173, %119 : vector<8x32xi1>, vector<8x32xf32>
      %178 = vector.broadcast %c2_i32 : i32 to vector<8x1xi32>
      %179 = arith.cmpi slt, %178, %13 : vector<8x1xi32>
      %180 = vector.shape_cast %179 : vector<8x1xi1> to vector<8x1xi1>
      %181 = vector.broadcast %180 : vector<8x1xi1> to vector<8x32xi1>
      %182 = arith.index_cast %c2_i32 : i32 to index
      %c0_47 = arith.constant 0 : index
      %c0_48 = arith.constant 0 : index
      %183 = vector.load %arg10[%182, %c0_47, %c0_48] : memref<8x8x128xf32, #tpu.memory_space<vmem>>, vector<1x8x128xf32>
      %184 = vector.shape_cast %183 : vector<1x8x128xf32> to vector<8x128xf32>
      %185 = vector.extract_strided_slice %148 {offsets = [0, 0], sizes = [8, 128], strides = [1, 1]} : vector<8x256xf32> to vector<8x128xf32>
      %186 = arith.addf %184, %185 : vector<8x128xf32>
      %187 = vector.extract_strided_slice %186 {offsets = [0, 0], sizes = [8, 96], strides = [1, 1]} : vector<8x128xf32> to vector<8x96xf32>
      %188 = arith.negf %187 : vector<8x96xf32>
      %189 = math.exp %188 : vector<8x96xf32>
      %cst_49 = arith.constant 1.000000e+00 : f32
      %190 = vector.broadcast %cst_49 : f32 to vector<8x96xf32>
      %191 = arith.addf %190, %189 : vector<8x96xf32>
      %192 = arith.divf %190, %191 : vector<8x96xf32>
      %193 = vector.extract_strided_slice %192 {offsets = [0, 0], sizes = [8, 32], strides = [1, 1]} : vector<8x96xf32> to vector<8x32xf32>
      %194 = vector.extract_strided_slice %192 {offsets = [0, 32], sizes = [8, 32], strides = [1, 1]} : vector<8x96xf32> to vector<8x32xf32>
      %195 = vector.extract_strided_slice %192 {offsets = [0, 64], sizes = [8, 32], strides = [1, 1]} : vector<8x96xf32> to vector<8x32xf32>
      %196 = vector.extract_strided_slice %186 {offsets = [0, 96], sizes = [8, 32], strides = [1, 1]} : vector<8x128xf32> to vector<8x32xf32>
      %197 = math.tanh %196 : vector<8x32xf32>
      %198 = arith.mulf %194, %146 : vector<8x32xf32>
      %199 = arith.mulf %193, %197 : vector<8x32xf32>
      %200 = arith.addf %198, %199 : vector<8x32xf32>
      %201 = math.tanh %200 : vector<8x32xf32>
      %202 = arith.mulf %195, %201 : vector<8x32xf32>
      %203 = arith.select %181, %202, %145 : vector<8x32xi1>, vector<8x32xf32>
      %204 = arith.select %181, %200, %146 : vector<8x32xi1>, vector<8x32xf32>
      %c3_i32 = arith.constant 3 : i32
      %205 = tpu.concatenate %203, %176 in 1 : vector<8x32xf32>, vector<8x32xf32> -> vector<8x64xf32>
      %cst_50 = arith.constant dense<0.000000e+00> : vector<8x256xf32>
      %206 = tpu.matmul %205, %14, %cst_50 {dimension_numbers = #tpu.dot_dimension_numbers<[1], [0], [0], [1], [0, 0, 1, 1], [], []>} : vector<8x64xf32>, vector<64x256xf32>, vector<8x256xf32> -> vector<8x256xf32>
      %c1_i32_51 = arith.constant 1 : i32
      %207 = arith.subi %c3_i32, %c1_i32_51 : i32
      %208 = vector.broadcast %207 : i32 to vector<8x1xi32>
      %209 = arith.cmpi slt, %208, %13 : vector<8x1xi32>
      %210 = arith.addi %0, %c3_i32 : i32
      %c1_i32_52 = arith.constant 1 : i32
      %211 = arith.cmpi sge, %210, %c1_i32_52 : i32
      %212 = vector.broadcast %211 : i1 to vector<8x1xi1>
      %213 = arith.andi %209, %212 : vector<8x1xi1>
      %214 = vector.shape_cast %213 : vector<8x1xi1> to vector<8x1xi1>
      %215 = vector.broadcast %214 : vector<8x1xi1> to vector<8x32xi1>
      %216 = vector.extract_strided_slice %206 {offsets = [0, 128], sizes = [8, 128], strides = [1, 1]} : vector<8x256xf32> to vector<8x128xf32>
      %217 = arith.addf %216, %17 : vector<8x128xf32>
      %218 = vector.extract_strided_slice %217 {offsets = [0, 0], sizes = [8, 96], strides = [1, 1]} : vector<8x128xf32> to vector<8x96xf32>
      %219 = arith.negf %218 : vector<8x96xf32>
      %220 = math.exp %219 : vector<8x96xf32>
      %cst_53 = arith.constant 1.000000e+00 : f32
      %221 = vector.broadcast %cst_53 : f32 to vector<8x96xf32>
      %222 = arith.addf %221, %220 : vector<8x96xf32>
      %223 = arith.divf %221, %222 : vector<8x96xf32>
      %224 = vector.extract_strided_slice %223 {offsets = [0, 0], sizes = [8, 32], strides = [1, 1]} : vector<8x96xf32> to vector<8x32xf32>
      %225 = vector.extract_strided_slice %223 {offsets = [0, 32], sizes = [8, 32], strides = [1, 1]} : vector<8x96xf32> to vector<8x32xf32>
      %226 = vector.extract_strided_slice %223 {offsets = [0, 64], sizes = [8, 32], strides = [1, 1]} : vector<8x96xf32> to vector<8x32xf32>
      %227 = vector.extract_strided_slice %217 {offsets = [0, 96], sizes = [8, 32], strides = [1, 1]} : vector<8x128xf32> to vector<8x32xf32>
      %228 = math.tanh %227 : vector<8x32xf32>
      %229 = arith.mulf %225, %177 : vector<8x32xf32>
      %230 = arith.mulf %224, %228 : vector<8x32xf32>
      %231 = arith.addf %229, %230 : vector<8x32xf32>
      %232 = math.tanh %231 : vector<8x32xf32>
      %233 = arith.mulf %226, %232 : vector<8x32xf32>
      %234 = arith.select %215, %233, %176 : vector<8x32xi1>, vector<8x32xf32>
      %235 = arith.select %215, %231, %177 : vector<8x32xi1>, vector<8x32xf32>
      %236 = vector.broadcast %c3_i32 : i32 to vector<8x1xi32>
      %237 = arith.cmpi slt, %236, %13 : vector<8x1xi32>
      %238 = vector.shape_cast %237 : vector<8x1xi1> to vector<8x1xi1>
      %239 = vector.broadcast %238 : vector<8x1xi1> to vector<8x32xi1>
      %240 = arith.index_cast %c3_i32 : i32 to index
      %c0_54 = arith.constant 0 : index
      %c0_55 = arith.constant 0 : index
      %241 = vector.load %arg10[%240, %c0_54, %c0_55] : memref<8x8x128xf32, #tpu.memory_space<vmem>>, vector<1x8x128xf32>
      %242 = vector.shape_cast %241 : vector<1x8x128xf32> to vector<8x128xf32>
      %243 = vector.extract_strided_slice %206 {offsets = [0, 0], sizes = [8, 128], strides = [1, 1]} : vector<8x256xf32> to vector<8x128xf32>
      %244 = arith.addf %242, %243 : vector<8x128xf32>
      %245 = vector.extract_strided_slice %244 {offsets = [0, 0], sizes = [8, 96], strides = [1, 1]} : vector<8x128xf32> to vector<8x96xf32>
      %246 = arith.negf %245 : vector<8x96xf32>
      %247 = math.exp %246 : vector<8x96xf32>
      %cst_56 = arith.constant 1.000000e+00 : f32
      %248 = vector.broadcast %cst_56 : f32 to vector<8x96xf32>
      %249 = arith.addf %248, %247 : vector<8x96xf32>
      %250 = arith.divf %248, %249 : vector<8x96xf32>
      %251 = vector.extract_strided_slice %250 {offsets = [0, 0], sizes = [8, 32], strides = [1, 1]} : vector<8x96xf32> to vector<8x32xf32>
      %252 = vector.extract_strided_slice %250 {offsets = [0, 32], sizes = [8, 32], strides = [1, 1]} : vector<8x96xf32> to vector<8x32xf32>
      %253 = vector.extract_strided_slice %250 {offsets = [0, 64], sizes = [8, 32], strides = [1, 1]} : vector<8x96xf32> to vector<8x32xf32>
      %254 = vector.extract_strided_slice %244 {offsets = [0, 96], sizes = [8, 32], strides = [1, 1]} : vector<8x128xf32> to vector<8x32xf32>
      %255 = math.tanh %254 : vector<8x32xf32>
      %256 = arith.mulf %252, %204 : vector<8x32xf32>
      %257 = arith.mulf %251, %255 : vector<8x32xf32>
      %258 = arith.addf %256, %257 : vector<8x32xf32>
      %259 = math.tanh %258 : vector<8x32xf32>
      %260 = arith.mulf %253, %259 : vector<8x32xf32>
      %261 = arith.select %239, %260, %203 : vector<8x32xi1>, vector<8x32xf32>
      %262 = arith.select %239, %258, %204 : vector<8x32xi1>, vector<8x32xf32>
      %c4_i32 = arith.constant 4 : i32
      %263 = tpu.concatenate %261, %234 in 1 : vector<8x32xf32>, vector<8x32xf32> -> vector<8x64xf32>
      %cst_57 = arith.constant dense<0.000000e+00> : vector<8x256xf32>
      %264 = tpu.matmul %263, %14, %cst_57 {dimension_numbers = #tpu.dot_dimension_numbers<[1], [0], [0], [1], [0, 0, 1, 1], [], []>} : vector<8x64xf32>, vector<64x256xf32>, vector<8x256xf32> -> vector<8x256xf32>
      %c1_i32_58 = arith.constant 1 : i32
      %265 = arith.subi %c4_i32, %c1_i32_58 : i32
      %266 = vector.broadcast %265 : i32 to vector<8x1xi32>
      %267 = arith.cmpi slt, %266, %13 : vector<8x1xi32>
      %268 = arith.addi %0, %c4_i32 : i32
      %c1_i32_59 = arith.constant 1 : i32
      %269 = arith.cmpi sge, %268, %c1_i32_59 : i32
      %270 = vector.broadcast %269 : i1 to vector<8x1xi1>
      %271 = arith.andi %267, %270 : vector<8x1xi1>
      %272 = vector.shape_cast %271 : vector<8x1xi1> to vector<8x1xi1>
      %273 = vector.broadcast %272 : vector<8x1xi1> to vector<8x32xi1>
      %274 = vector.extract_strided_slice %264 {offsets = [0, 128], sizes = [8, 128], strides = [1, 1]} : vector<8x256xf32> to vector<8x128xf32>
      %275 = arith.addf %274, %17 : vector<8x128xf32>
      %276 = vector.extract_strided_slice %275 {offsets = [0, 0], sizes = [8, 96], strides = [1, 1]} : vector<8x128xf32> to vector<8x96xf32>
      %277 = arith.negf %276 : vector<8x96xf32>
      %278 = math.exp %277 : vector<8x96xf32>
      %cst_60 = arith.constant 1.000000e+00 : f32
      %279 = vector.broadcast %cst_60 : f32 to vector<8x96xf32>
      %280 = arith.addf %279, %278 : vector<8x96xf32>
      %281 = arith.divf %279, %280 : vector<8x96xf32>
      %282 = vector.extract_strided_slice %281 {offsets = [0, 0], sizes = [8, 32], strides = [1, 1]} : vector<8x96xf32> to vector<8x32xf32>
      %283 = vector.extract_strided_slice %281 {offsets = [0, 32], sizes = [8, 32], strides = [1, 1]} : vector<8x96xf32> to vector<8x32xf32>
      %284 = vector.extract_strided_slice %281 {offsets = [0, 64], sizes = [8, 32], strides = [1, 1]} : vector<8x96xf32> to vector<8x32xf32>
      %285 = vector.extract_strided_slice %275 {offsets = [0, 96], sizes = [8, 32], strides = [1, 1]} : vector<8x128xf32> to vector<8x32xf32>
      %286 = math.tanh %285 : vector<8x32xf32>
      %287 = arith.mulf %283, %235 : vector<8x32xf32>
      %288 = arith.mulf %282, %286 : vector<8x32xf32>
      %289 = arith.addf %287, %288 : vector<8x32xf32>
      %290 = math.tanh %289 : vector<8x32xf32>
      %291 = arith.mulf %284, %290 : vector<8x32xf32>
      %292 = arith.select %273, %291, %234 : vector<8x32xi1>, vector<8x32xf32>
      %293 = arith.select %273, %289, %235 : vector<8x32xi1>, vector<8x32xf32>
      %294 = vector.broadcast %c4_i32 : i32 to vector<8x1xi32>
      %295 = arith.cmpi slt, %294, %13 : vector<8x1xi32>
      %296 = vector.shape_cast %295 : vector<8x1xi1> to vector<8x1xi1>
      %297 = vector.broadcast %296 : vector<8x1xi1> to vector<8x32xi1>
      %298 = arith.index_cast %c4_i32 : i32 to index
      %c0_61 = arith.constant 0 : index
      %c0_62 = arith.constant 0 : index
      %299 = vector.load %arg10[%298, %c0_61, %c0_62] : memref<8x8x128xf32, #tpu.memory_space<vmem>>, vector<1x8x128xf32>
      %300 = vector.shape_cast %299 : vector<1x8x128xf32> to vector<8x128xf32>
      %301 = vector.extract_strided_slice %264 {offsets = [0, 0], sizes = [8, 128], strides = [1, 1]} : vector<8x256xf32> to vector<8x128xf32>
      %302 = arith.addf %300, %301 : vector<8x128xf32>
      %303 = vector.extract_strided_slice %302 {offsets = [0, 0], sizes = [8, 96], strides = [1, 1]} : vector<8x128xf32> to vector<8x96xf32>
      %304 = arith.negf %303 : vector<8x96xf32>
      %305 = math.exp %304 : vector<8x96xf32>
      %cst_63 = arith.constant 1.000000e+00 : f32
      %306 = vector.broadcast %cst_63 : f32 to vector<8x96xf32>
      %307 = arith.addf %306, %305 : vector<8x96xf32>
      %308 = arith.divf %306, %307 : vector<8x96xf32>
      %309 = vector.extract_strided_slice %308 {offsets = [0, 0], sizes = [8, 32], strides = [1, 1]} : vector<8x96xf32> to vector<8x32xf32>
      %310 = vector.extract_strided_slice %308 {offsets = [0, 32], sizes = [8, 32], strides = [1, 1]} : vector<8x96xf32> to vector<8x32xf32>
      %311 = vector.extract_strided_slice %308 {offsets = [0, 64], sizes = [8, 32], strides = [1, 1]} : vector<8x96xf32> to vector<8x32xf32>
      %312 = vector.extract_strided_slice %302 {offsets = [0, 96], sizes = [8, 32], strides = [1, 1]} : vector<8x128xf32> to vector<8x32xf32>
      %313 = math.tanh %312 : vector<8x32xf32>
      %314 = arith.mulf %310, %262 : vector<8x32xf32>
      %315 = arith.mulf %309, %313 : vector<8x32xf32>
      %316 = arith.addf %314, %315 : vector<8x32xf32>
      %317 = math.tanh %316 : vector<8x32xf32>
      %318 = arith.mulf %311, %317 : vector<8x32xf32>
      %319 = arith.select %297, %318, %261 : vector<8x32xi1>, vector<8x32xf32>
      %320 = arith.select %297, %316, %262 : vector<8x32xi1>, vector<8x32xf32>
      %c5_i32 = arith.constant 5 : i32
      %321 = tpu.concatenate %319, %292 in 1 : vector<8x32xf32>, vector<8x32xf32> -> vector<8x64xf32>
      %cst_64 = arith.constant dense<0.000000e+00> : vector<8x256xf32>
      %322 = tpu.matmul %321, %14, %cst_64 {dimension_numbers = #tpu.dot_dimension_numbers<[1], [0], [0], [1], [0, 0, 1, 1], [], []>} : vector<8x64xf32>, vector<64x256xf32>, vector<8x256xf32> -> vector<8x256xf32>
      %c1_i32_65 = arith.constant 1 : i32
      %323 = arith.subi %c5_i32, %c1_i32_65 : i32
      %324 = vector.broadcast %323 : i32 to vector<8x1xi32>
      %325 = arith.cmpi slt, %324, %13 : vector<8x1xi32>
      %326 = arith.addi %0, %c5_i32 : i32
      %c1_i32_66 = arith.constant 1 : i32
      %327 = arith.cmpi sge, %326, %c1_i32_66 : i32
      %328 = vector.broadcast %327 : i1 to vector<8x1xi1>
      %329 = arith.andi %325, %328 : vector<8x1xi1>
      %330 = vector.shape_cast %329 : vector<8x1xi1> to vector<8x1xi1>
      %331 = vector.broadcast %330 : vector<8x1xi1> to vector<8x32xi1>
      %332 = vector.extract_strided_slice %322 {offsets = [0, 128], sizes = [8, 128], strides = [1, 1]} : vector<8x256xf32> to vector<8x128xf32>
      %333 = arith.addf %332, %17 : vector<8x128xf32>
      %334 = vector.extract_strided_slice %333 {offsets = [0, 0], sizes = [8, 96], strides = [1, 1]} : vector<8x128xf32> to vector<8x96xf32>
      %335 = arith.negf %334 : vector<8x96xf32>
      %336 = math.exp %335 : vector<8x96xf32>
      %cst_67 = arith.constant 1.000000e+00 : f32
      %337 = vector.broadcast %cst_67 : f32 to vector<8x96xf32>
      %338 = arith.addf %337, %336 : vector<8x96xf32>
      %339 = arith.divf %337, %338 : vector<8x96xf32>
      %340 = vector.extract_strided_slice %339 {offsets = [0, 0], sizes = [8, 32], strides = [1, 1]} : vector<8x96xf32> to vector<8x32xf32>
      %341 = vector.extract_strided_slice %339 {offsets = [0, 32], sizes = [8, 32], strides = [1, 1]} : vector<8x96xf32> to vector<8x32xf32>
      %342 = vector.extract_strided_slice %339 {offsets = [0, 64], sizes = [8, 32], strides = [1, 1]} : vector<8x96xf32> to vector<8x32xf32>
      %343 = vector.extract_strided_slice %333 {offsets = [0, 96], sizes = [8, 32], strides = [1, 1]} : vector<8x128xf32> to vector<8x32xf32>
      %344 = math.tanh %343 : vector<8x32xf32>
      %345 = arith.mulf %341, %293 : vector<8x32xf32>
      %346 = arith.mulf %340, %344 : vector<8x32xf32>
      %347 = arith.addf %345, %346 : vector<8x32xf32>
      %348 = math.tanh %347 : vector<8x32xf32>
      %349 = arith.mulf %342, %348 : vector<8x32xf32>
      %350 = arith.select %331, %349, %292 : vector<8x32xi1>, vector<8x32xf32>
      %351 = arith.select %331, %347, %293 : vector<8x32xi1>, vector<8x32xf32>
      %352 = vector.broadcast %c5_i32 : i32 to vector<8x1xi32>
      %353 = arith.cmpi slt, %352, %13 : vector<8x1xi32>
      %354 = vector.shape_cast %353 : vector<8x1xi1> to vector<8x1xi1>
      %355 = vector.broadcast %354 : vector<8x1xi1> to vector<8x32xi1>
      %356 = arith.index_cast %c5_i32 : i32 to index
      %c0_68 = arith.constant 0 : index
      %c0_69 = arith.constant 0 : index
      %357 = vector.load %arg10[%356, %c0_68, %c0_69] : memref<8x8x128xf32, #tpu.memory_space<vmem>>, vector<1x8x128xf32>
      %358 = vector.shape_cast %357 : vector<1x8x128xf32> to vector<8x128xf32>
      %359 = vector.extract_strided_slice %322 {offsets = [0, 0], sizes = [8, 128], strides = [1, 1]} : vector<8x256xf32> to vector<8x128xf32>
      %360 = arith.addf %358, %359 : vector<8x128xf32>
      %361 = vector.extract_strided_slice %360 {offsets = [0, 0], sizes = [8, 96], strides = [1, 1]} : vector<8x128xf32> to vector<8x96xf32>
      %362 = arith.negf %361 : vector<8x96xf32>
      %363 = math.exp %362 : vector<8x96xf32>
      %cst_70 = arith.constant 1.000000e+00 : f32
      %364 = vector.broadcast %cst_70 : f32 to vector<8x96xf32>
      %365 = arith.addf %364, %363 : vector<8x96xf32>
      %366 = arith.divf %364, %365 : vector<8x96xf32>
      %367 = vector.extract_strided_slice %366 {offsets = [0, 0], sizes = [8, 32], strides = [1, 1]} : vector<8x96xf32> to vector<8x32xf32>
      %368 = vector.extract_strided_slice %366 {offsets = [0, 32], sizes = [8, 32], strides = [1, 1]} : vector<8x96xf32> to vector<8x32xf32>
      %369 = vector.extract_strided_slice %366 {offsets = [0, 64], sizes = [8, 32], strides = [1, 1]} : vector<8x96xf32> to vector<8x32xf32>
      %370 = vector.extract_strided_slice %360 {offsets = [0, 96], sizes = [8, 32], strides = [1, 1]} : vector<8x128xf32> to vector<8x32xf32>
      %371 = math.tanh %370 : vector<8x32xf32>
      %372 = arith.mulf %368, %320 : vector<8x32xf32>
      %373 = arith.mulf %367, %371 : vector<8x32xf32>
      %374 = arith.addf %372, %373 : vector<8x32xf32>
      %375 = math.tanh %374 : vector<8x32xf32>
      %376 = arith.mulf %369, %375 : vector<8x32xf32>
      %377 = arith.select %355, %376, %319 : vector<8x32xi1>, vector<8x32xf32>
      %378 = arith.select %355, %374, %320 : vector<8x32xi1>, vector<8x32xf32>
      %c6_i32 = arith.constant 6 : i32
      %379 = tpu.concatenate %377, %350 in 1 : vector<8x32xf32>, vector<8x32xf32> -> vector<8x64xf32>
      %cst_71 = arith.constant dense<0.000000e+00> : vector<8x256xf32>
      %380 = tpu.matmul %379, %14, %cst_71 {dimension_numbers = #tpu.dot_dimension_numbers<[1], [0], [0], [1], [0, 0, 1, 1], [], []>} : vector<8x64xf32>, vector<64x256xf32>, vector<8x256xf32> -> vector<8x256xf32>
      %c1_i32_72 = arith.constant 1 : i32
      %381 = arith.subi %c6_i32, %c1_i32_72 : i32
      %382 = vector.broadcast %381 : i32 to vector<8x1xi32>
      %383 = arith.cmpi slt, %382, %13 : vector<8x1xi32>
      %384 = arith.addi %0, %c6_i32 : i32
      %c1_i32_73 = arith.constant 1 : i32
      %385 = arith.cmpi sge, %384, %c1_i32_73 : i32
      %386 = vector.broadcast %385 : i1 to vector<8x1xi1>
      %387 = arith.andi %383, %386 : vector<8x1xi1>
      %388 = vector.shape_cast %387 : vector<8x1xi1> to vector<8x1xi1>
      %389 = vector.broadcast %388 : vector<8x1xi1> to vector<8x32xi1>
      %390 = vector.extract_strided_slice %380 {offsets = [0, 128], sizes = [8, 128], strides = [1, 1]} : vector<8x256xf32> to vector<8x128xf32>
      %391 = arith.addf %390, %17 : vector<8x128xf32>
      %392 = vector.extract_strided_slice %391 {offsets = [0, 0], sizes = [8, 96], strides = [1, 1]} : vector<8x128xf32> to vector<8x96xf32>
      %393 = arith.negf %392 : vector<8x96xf32>
      %394 = math.exp %393 : vector<8x96xf32>
      %cst_74 = arith.constant 1.000000e+00 : f32
      %395 = vector.broadcast %cst_74 : f32 to vector<8x96xf32>
      %396 = arith.addf %395, %394 : vector<8x96xf32>
      %397 = arith.divf %395, %396 : vector<8x96xf32>
      %398 = vector.extract_strided_slice %397 {offsets = [0, 0], sizes = [8, 32], strides = [1, 1]} : vector<8x96xf32> to vector<8x32xf32>
      %399 = vector.extract_strided_slice %397 {offsets = [0, 32], sizes = [8, 32], strides = [1, 1]} : vector<8x96xf32> to vector<8x32xf32>
      %400 = vector.extract_strided_slice %397 {offsets = [0, 64], sizes = [8, 32], strides = [1, 1]} : vector<8x96xf32> to vector<8x32xf32>
      %401 = vector.extract_strided_slice %391 {offsets = [0, 96], sizes = [8, 32], strides = [1, 1]} : vector<8x128xf32> to vector<8x32xf32>
      %402 = math.tanh %401 : vector<8x32xf32>
      %403 = arith.mulf %399, %351 : vector<8x32xf32>
      %404 = arith.mulf %398, %402 : vector<8x32xf32>
      %405 = arith.addf %403, %404 : vector<8x32xf32>
      %406 = math.tanh %405 : vector<8x32xf32>
      %407 = arith.mulf %400, %406 : vector<8x32xf32>
      %408 = arith.select %389, %407, %350 : vector<8x32xi1>, vector<8x32xf32>
      %409 = arith.select %389, %405, %351 : vector<8x32xi1>, vector<8x32xf32>
      %410 = vector.broadcast %c6_i32 : i32 to vector<8x1xi32>
      %411 = arith.cmpi slt, %410, %13 : vector<8x1xi32>
      %412 = vector.shape_cast %411 : vector<8x1xi1> to vector<8x1xi1>
      %413 = vector.broadcast %412 : vector<8x1xi1> to vector<8x32xi1>
      %414 = arith.index_cast %c6_i32 : i32 to index
      %c0_75 = arith.constant 0 : index
      %c0_76 = arith.constant 0 : index
      %415 = vector.load %arg10[%414, %c0_75, %c0_76] : memref<8x8x128xf32, #tpu.memory_space<vmem>>, vector<1x8x128xf32>
      %416 = vector.shape_cast %415 : vector<1x8x128xf32> to vector<8x128xf32>
      %417 = vector.extract_strided_slice %380 {offsets = [0, 0], sizes = [8, 128], strides = [1, 1]} : vector<8x256xf32> to vector<8x128xf32>
      %418 = arith.addf %416, %417 : vector<8x128xf32>
      %419 = vector.extract_strided_slice %418 {offsets = [0, 0], sizes = [8, 96], strides = [1, 1]} : vector<8x128xf32> to vector<8x96xf32>
      %420 = arith.negf %419 : vector<8x96xf32>
      %421 = math.exp %420 : vector<8x96xf32>
      %cst_77 = arith.constant 1.000000e+00 : f32
      %422 = vector.broadcast %cst_77 : f32 to vector<8x96xf32>
      %423 = arith.addf %422, %421 : vector<8x96xf32>
      %424 = arith.divf %422, %423 : vector<8x96xf32>
      %425 = vector.extract_strided_slice %424 {offsets = [0, 0], sizes = [8, 32], strides = [1, 1]} : vector<8x96xf32> to vector<8x32xf32>
      %426 = vector.extract_strided_slice %424 {offsets = [0, 32], sizes = [8, 32], strides = [1, 1]} : vector<8x96xf32> to vector<8x32xf32>
      %427 = vector.extract_strided_slice %424 {offsets = [0, 64], sizes = [8, 32], strides = [1, 1]} : vector<8x96xf32> to vector<8x32xf32>
      %428 = vector.extract_strided_slice %418 {offsets = [0, 96], sizes = [8, 32], strides = [1, 1]} : vector<8x128xf32> to vector<8x32xf32>
      %429 = math.tanh %428 : vector<8x32xf32>
      %430 = arith.mulf %426, %378 : vector<8x32xf32>
      %431 = arith.mulf %425, %429 : vector<8x32xf32>
      %432 = arith.addf %430, %431 : vector<8x32xf32>
      %433 = math.tanh %432 : vector<8x32xf32>
      %434 = arith.mulf %427, %433 : vector<8x32xf32>
      %435 = arith.select %413, %434, %377 : vector<8x32xi1>, vector<8x32xf32>
      %436 = arith.select %413, %432, %378 : vector<8x32xi1>, vector<8x32xf32>
      %c7_i32 = arith.constant 7 : i32
      %437 = tpu.concatenate %435, %408 in 1 : vector<8x32xf32>, vector<8x32xf32> -> vector<8x64xf32>
      %cst_78 = arith.constant dense<0.000000e+00> : vector<8x256xf32>
      %438 = tpu.matmul %437, %14, %cst_78 {dimension_numbers = #tpu.dot_dimension_numbers<[1], [0], [0], [1], [0, 0, 1, 1], [], []>} : vector<8x64xf32>, vector<64x256xf32>, vector<8x256xf32> -> vector<8x256xf32>
      %c1_i32_79 = arith.constant 1 : i32
      %439 = arith.subi %c7_i32, %c1_i32_79 : i32
      %440 = vector.broadcast %439 : i32 to vector<8x1xi32>
      %441 = arith.cmpi slt, %440, %13 : vector<8x1xi32>
      %442 = arith.addi %0, %c7_i32 : i32
      %c1_i32_80 = arith.constant 1 : i32
      %443 = arith.cmpi sge, %442, %c1_i32_80 : i32
      %444 = vector.broadcast %443 : i1 to vector<8x1xi1>
      %445 = arith.andi %441, %444 : vector<8x1xi1>
      %446 = vector.shape_cast %445 : vector<8x1xi1> to vector<8x1xi1>
      %447 = vector.broadcast %446 : vector<8x1xi1> to vector<8x32xi1>
      %448 = vector.extract_strided_slice %438 {offsets = [0, 128], sizes = [8, 128], strides = [1, 1]} : vector<8x256xf32> to vector<8x128xf32>
      %449 = arith.addf %448, %17 : vector<8x128xf32>
      %450 = vector.extract_strided_slice %449 {offsets = [0, 0], sizes = [8, 96], strides = [1, 1]} : vector<8x128xf32> to vector<8x96xf32>
      %451 = arith.negf %450 : vector<8x96xf32>
      %452 = math.exp %451 : vector<8x96xf32>
      %cst_81 = arith.constant 1.000000e+00 : f32
      %453 = vector.broadcast %cst_81 : f32 to vector<8x96xf32>
      %454 = arith.addf %453, %452 : vector<8x96xf32>
      %455 = arith.divf %453, %454 : vector<8x96xf32>
      %456 = vector.extract_strided_slice %455 {offsets = [0, 0], sizes = [8, 32], strides = [1, 1]} : vector<8x96xf32> to vector<8x32xf32>
      %457 = vector.extract_strided_slice %455 {offsets = [0, 32], sizes = [8, 32], strides = [1, 1]} : vector<8x96xf32> to vector<8x32xf32>
      %458 = vector.extract_strided_slice %455 {offsets = [0, 64], sizes = [8, 32], strides = [1, 1]} : vector<8x96xf32> to vector<8x32xf32>
      %459 = vector.extract_strided_slice %449 {offsets = [0, 96], sizes = [8, 32], strides = [1, 1]} : vector<8x128xf32> to vector<8x32xf32>
      %460 = math.tanh %459 : vector<8x32xf32>
      %461 = arith.mulf %457, %409 : vector<8x32xf32>
      %462 = arith.mulf %456, %460 : vector<8x32xf32>
      %463 = arith.addf %461, %462 : vector<8x32xf32>
      %464 = math.tanh %463 : vector<8x32xf32>
      %465 = arith.mulf %458, %464 : vector<8x32xf32>
      %466 = arith.select %447, %465, %408 : vector<8x32xi1>, vector<8x32xf32>
      %467 = arith.select %447, %463, %409 : vector<8x32xi1>, vector<8x32xf32>
      %468 = vector.broadcast %c7_i32 : i32 to vector<8x1xi32>
      %469 = arith.cmpi slt, %468, %13 : vector<8x1xi32>
      %470 = vector.shape_cast %469 : vector<8x1xi1> to vector<8x1xi1>
      %471 = vector.broadcast %470 : vector<8x1xi1> to vector<8x32xi1>
      %472 = arith.index_cast %c7_i32 : i32 to index
      %c0_82 = arith.constant 0 : index
      %c0_83 = arith.constant 0 : index
      %473 = vector.load %arg10[%472, %c0_82, %c0_83] : memref<8x8x128xf32, #tpu.memory_space<vmem>>, vector<1x8x128xf32>
      %474 = vector.shape_cast %473 : vector<1x8x128xf32> to vector<8x128xf32>
      %475 = vector.extract_strided_slice %438 {offsets = [0, 0], sizes = [8, 128], strides = [1, 1]} : vector<8x256xf32> to vector<8x128xf32>
      %476 = arith.addf %474, %475 : vector<8x128xf32>
      %477 = vector.extract_strided_slice %476 {offsets = [0, 0], sizes = [8, 96], strides = [1, 1]} : vector<8x128xf32> to vector<8x96xf32>
      %478 = arith.negf %477 : vector<8x96xf32>
      %479 = math.exp %478 : vector<8x96xf32>
      %cst_84 = arith.constant 1.000000e+00 : f32
      %480 = vector.broadcast %cst_84 : f32 to vector<8x96xf32>
      %481 = arith.addf %480, %479 : vector<8x96xf32>
      %482 = arith.divf %480, %481 : vector<8x96xf32>
      %483 = vector.extract_strided_slice %482 {offsets = [0, 0], sizes = [8, 32], strides = [1, 1]} : vector<8x96xf32> to vector<8x32xf32>
      %484 = vector.extract_strided_slice %482 {offsets = [0, 32], sizes = [8, 32], strides = [1, 1]} : vector<8x96xf32> to vector<8x32xf32>
      %485 = vector.extract_strided_slice %482 {offsets = [0, 64], sizes = [8, 32], strides = [1, 1]} : vector<8x96xf32> to vector<8x32xf32>
      %486 = vector.extract_strided_slice %476 {offsets = [0, 96], sizes = [8, 32], strides = [1, 1]} : vector<8x128xf32> to vector<8x32xf32>
      %487 = math.tanh %486 : vector<8x32xf32>
      %488 = arith.mulf %484, %436 : vector<8x32xf32>
      %489 = arith.mulf %483, %487 : vector<8x32xf32>
      %490 = arith.addf %488, %489 : vector<8x32xf32>
      %491 = math.tanh %490 : vector<8x32xf32>
      %492 = arith.mulf %485, %491 : vector<8x32xf32>
      %493 = arith.select %471, %492, %435 : vector<8x32xi1>, vector<8x32xf32>
      %494 = arith.select %471, %490, %436 : vector<8x32xi1>, vector<8x32xf32>
      %c8_i32_85 = arith.constant 8 : i32
      %c0_86 = arith.constant 0 : index
      %c0_87 = arith.constant 0 : index
      %495 = vector.load %arg11[%c0_86, %c0_87] : memref<8x32xf32, #tpu.memory_space<vmem>>, vector<8x32xf32>
      tpu.vector_store %arg11[%c0_86, %c0_87], %493 {strides = array<i32>} : memref<8x32xf32, #tpu.memory_space<vmem>>, vector<8x32xf32>,
      %c0_88 = arith.constant 0 : index
      %c0_89 = arith.constant 0 : index
      %496 = vector.load %arg12[%c0_88, %c0_89] : memref<8x32xf32, #tpu.memory_space<vmem>>, vector<8x32xf32>
      tpu.vector_store %arg12[%c0_88, %c0_89], %494 {strides = array<i32>} : memref<8x32xf32, #tpu.memory_space<vmem>>, vector<8x32xf32>,
      %c0_90 = arith.constant 0 : index
      %c0_91 = arith.constant 0 : index
      %497 = vector.load %arg13[%c0_90, %c0_91] : memref<8x32xf32, #tpu.memory_space<vmem>>, vector<8x32xf32>
      tpu.vector_store %arg13[%c0_90, %c0_91], %466 {strides = array<i32>} : memref<8x32xf32, #tpu.memory_space<vmem>>, vector<8x32xf32>,
      %c0_92 = arith.constant 0 : index
      %c0_93 = arith.constant 0 : index
      %498 = vector.load %arg14[%c0_92, %c0_93] : memref<8x32xf32, #tpu.memory_space<vmem>>, vector<8x32xf32>
      tpu.vector_store %arg14[%c0_92, %c0_93], %467 {strides = array<i32>} : memref<8x32xf32, #tpu.memory_space<vmem>>, vector<8x32xf32>,
    } else {
    }
    %c0_i32_2 = arith.constant 0 : i32
    %8 = arith.cmpi eq, %arg1, %c0_i32_2 : i32
    %9 = arith.extui %8 : i1 to i32
    %c0_i32_3 = arith.constant 0 : i32
    %10 = arith.cmpi ne, %9, %c0_i32_3 : i32
    scf.if %10 {
      %c0_4 = arith.constant 0 : index
      %c0_5 = arith.constant 0 : index
      %11 = vector.load %arg3[%c0_4, %c0_5] : memref<8x1xi32, #tpu.memory_space<vmem>>, vector<8x1xi32>
      %c1 = arith.constant 1 : index
      %12 = memref.load %arg2[%c1] : memref<2xi32, #tpu.memory_space<smem>>
      %c8_i32_6 = arith.constant 8 : i32
      %13 = arith.muli %12, %c8_i32_6 : i32
      %c7_i32 = arith.constant 7 : i32
      %14 = arith.addi %13, %c7_i32 : i32
      %15 = vector.broadcast %14 : i32 to vector<8x1xi32>
      %16 = arith.cmpi sgt, %11, %15 : vector<8x1xi32>
      %c0_i32_7 = arith.constant 0 : i32
      %17 = vector.broadcast %c0_i32_7 : i32 to vector<8x1xi32>
      %18 = arith.cmpi sgt, %11, %17 : vector<8x1xi32>
      %19 = arith.andi %16, %18 : vector<8x1xi1>
      %20 = vector.shape_cast %19 : vector<8x1xi1> to vector<8x1xi1>
      %21 = vector.broadcast %20 : vector<8x1xi1> to vector<8x32xi1>
      %c0_8 = arith.constant 0 : index
      %c128 = arith.constant 128 : index
      %22 = vector.load %arg7[%c0_8, %c128] : memref<64x256xf32, #tpu.memory_space<vmem>>, vector<64x128xf32>
      %c0_9 = arith.constant 0 : index
      %c0_10 = arith.constant 0 : index
      %23 = vector.load %arg11[%c0_9, %c0_10] : memref<8x32xf32, #tpu.memory_space<vmem>>, vector<8x32xf32>
      %c0_11 = arith.constant 0 : index
      %c0_12 = arith.constant 0 : index
      %24 = vector.load %arg13[%c0_11, %c0_12] : memref<8x32xf32, #tpu.memory_space<vmem>>, vector<8x32xf32>
      %25 = tpu.concatenate %23, %24 in 1 : vector<8x32xf32>, vector<8x32xf32> -> vector<8x64xf32>
      %cst = arith.constant dense<0.000000e+00> : vector<8x128xf32>
      %26 = tpu.matmul %25, %22, %cst {dimension_numbers = #tpu.dot_dimension_numbers<[1], [0], [0], [1], [0, 0, 1, 1], [], []>} : vector<8x64xf32>, vector<64x128xf32>, vector<8x128xf32> -> vector<8x128xf32>
      %c0_13 = arith.constant 0 : index
      %c0_14 = arith.constant 0 : index
      %27 = vector.load %arg8[%c0_13, %c0_14] : memref<1x128xf32, #tpu.memory_space<vmem>>, vector<1x128xf32>
      %28 = vector.broadcast %27 : vector<1x128xf32> to vector<8x128xf32>
      %29 = arith.addf %26, %28 : vector<8x128xf32>
      %c0_15 = arith.constant 0 : index
      %c0_16 = arith.constant 0 : index
      %30 = vector.load %arg14[%c0_15, %c0_16] : memref<8x32xf32, #tpu.memory_space<vmem>>, vector<8x32xf32>
      %31 = vector.extract_strided_slice %29 {offsets = [0, 0], sizes = [8, 96], strides = [1, 1]} : vector<8x128xf32> to vector<8x96xf32>
      %32 = arith.negf %31 : vector<8x96xf32>
      %33 = math.exp %32 : vector<8x96xf32>
      %cst_17 = arith.constant 1.000000e+00 : f32
      %34 = vector.broadcast %cst_17 : f32 to vector<8x96xf32>
      %35 = arith.addf %34, %33 : vector<8x96xf32>
      %36 = arith.divf %34, %35 : vector<8x96xf32>
      %37 = vector.extract_strided_slice %36 {offsets = [0, 0], sizes = [8, 32], strides = [1, 1]} : vector<8x96xf32> to vector<8x32xf32>
      %38 = vector.extract_strided_slice %36 {offsets = [0, 32], sizes = [8, 32], strides = [1, 1]} : vector<8x96xf32> to vector<8x32xf32>
      %39 = vector.extract_strided_slice %36 {offsets = [0, 64], sizes = [8, 32], strides = [1, 1]} : vector<8x96xf32> to vector<8x32xf32>
      %40 = vector.extract_strided_slice %29 {offsets = [0, 96], sizes = [8, 32], strides = [1, 1]} : vector<8x128xf32> to vector<8x32xf32>
      %41 = math.tanh %40 : vector<8x32xf32>
      %42 = arith.mulf %38, %30 : vector<8x32xf32>
      %43 = arith.mulf %37, %41 : vector<8x32xf32>
      %44 = arith.addf %42, %43 : vector<8x32xf32>
      %45 = math.tanh %44 : vector<8x32xf32>
      %46 = arith.mulf %39, %45 : vector<8x32xf32>
      %c0_18 = arith.constant 0 : index
      %c0_19 = arith.constant 0 : index
      %47 = vector.load %arg13[%c0_18, %c0_19] : memref<8x32xf32, #tpu.memory_space<vmem>>, vector<8x32xf32>
      %48 = arith.select %21, %46, %47 : vector<8x32xi1>, vector<8x32xf32>
      %c0_20 = arith.constant 0 : index
      %c0_21 = arith.constant 0 : index
      %49 = vector.load %arg9[%c0_20, %c0_21] : memref<8x32xf32, #tpu.memory_space<vmem>>, vector<8x32xf32>
      tpu.vector_store %arg9[%c0_20, %c0_21], %48 {strides = array<i32>} : memref<8x32xf32, #tpu.memory_space<vmem>>, vector<8x32xf32>,
    } else {
    }
    return
  }
  func.func @transform_0(%arg0: i32, %arg1: i32, %arg2: memref<2xi32, #tpu.memory_space<smem>>) -> (i32, i32) {
    %c0_i32 = arith.constant 0 : i32
    %c0_i32_0 = arith.constant 0 : i32
    return %arg0, %c0_i32 : i32, i32
  }
  func.func @transform_1(%arg0: i32, %arg1: i32, %arg2: memref<2xi32, #tpu.memory_space<smem>>) -> (i32, i32, i32) {
    %c1 = arith.constant 1 : index
    %0 = memref.load %arg2[%c1] : memref<2xi32, #tpu.memory_space<smem>>
    %1 = arith.minsi %arg1, %0 : i32
    %c0_i32 = arith.constant 0 : i32
    %c0_i32_0 = arith.constant 0 : i32
    return %1, %arg0, %c0_i32 : i32, i32, i32
  }
  func.func @transform_2(%arg0: i32, %arg1: i32, %arg2: memref<2xi32, #tpu.memory_space<smem>>) -> (i32, i32) {
    %c0_i32 = arith.constant 0 : i32
    %c0_i32_0 = arith.constant 0 : i32
    %c0_i32_1 = arith.constant 0 : i32
    return %c0_i32, %c0_i32_0 : i32, i32
  }
  func.func @transform_3(%arg0: i32, %arg1: i32, %arg2: memref<2xi32, #tpu.memory_space<smem>>) -> (i32, i32) {
    %c0_i32 = arith.constant 0 : i32
    %c0_i32_0 = arith.constant 0 : i32
    %c0_i32_1 = arith.constant 0 : i32
    return %c0_i32, %c0_i32_0 : i32, i32
  }
  func.func @transform_4(%arg0: i32, %arg1: i32, %arg2: memref<2xi32, #tpu.memory_space<smem>>) -> (i32, i32) {
    %c0_i32 = arith.constant 0 : i32
    %c0_i32_0 = arith.constant 0 : i32
    %c0_i32_1 = arith.constant 0 : i32
    return %c0_i32, %c0_i32_0 : i32, i32
  }
  func.func @transform_5(%arg0: i32, %arg1: i32, %arg2: memref<2xi32, #tpu.memory_space<smem>>) -> (i32, i32) {
    %c0_i32 = arith.constant 0 : i32
    %c0_i32_0 = arith.constant 0 : i32
    %c0_i32_1 = arith.constant 0 : i32
    return %c0_i32, %c0_i32_0 : i32, i32
  }
  func.func @transform_6(%arg0: i32, %arg1: i32, %arg2: memref<2xi32, #tpu.memory_space<smem>>) -> (i32, i32) {
    %c0_i32 = arith.constant 0 : i32
    %c0_i32_0 = arith.constant 0 : i32
    return %arg0, %c0_i32 : i32, i32
  }
}

</mosaic_0001>

<bundles_post_ra>
// kernel: tpu_custom_call.1
= control target key start
LH: loop header
LB: loop body
LE: loop exit
PB: predicated region body
PF: predicated region fallthrough
CT: control target
= control target key end

     0   :  { %s2835_s0 = inlined_call_operand.vmem [shape: s32[2], index: 0, kind: input, shape index: {}]   ;;  %s2836_s1 = inlined_call_operand.vmem [shape: s32[8,1], index: 1, kind: input, shape index: {}]   ;;  %s2837_s2 = inlined_call_operand.hbm [shape: f32[8,8,16], index: 2, kind: input, shape index: {}]   ;;  %s2838_s3 = inlined_call_operand.hbm [shape: f32[16,128], index: 3, kind: input, shape index: {}]   ;;  %s2839_s4 = inlined_call_operand.vmem [shape: f32[1,128], index: 4, kind: input, shape index: {}]   ;;  %s2840_s5 = inlined_call_operand.hbm [shape: f32[64,256], index: 5, kind: input, shape index: {}]   ;;  %s2841_s6 = inlined_call_operand.vmem [shape: f32[1,128], index: 6, kind: input, shape index: {}]   ;;  %s2842_s7 = inlined_call_operand.hbm [shape: f32[8,32], index: 7, kind: output, shape index: {}]  }
   0x1   :  { %s12_s26 = sshll.u32 %s2835_s0, 4  ;;  %s13_s26 = int_to_ptr.vmem [resolvable:$true] %s12_s26 }
   0x2   :  { %s1992_s27 = scalar_lea.vmem %s13_s26, 16  ;;  %p1997_p1 = scmp.lt.s32.totalorder %s13_s26, %s13_s26 }
   0x3   :  { %p1993_p0 = scmp.ne.s32.totalorder %s13_s26, %s1992_s27  ;;  %p1998_p2 = scmp.lt.s32.totalorder %s1992_s27, %s1992_s27 }
   0x5   :  { %p1999_p3 = por %p1998_p2, %p1997_p1 }
   0x7   :  { %p2000_p4 = pnand %p1999_p3, %p1993_p0 }
   0x9   :  { %2003 = shalt.err (!%p2000_p4)  }
   0xa   :  { %s2094_s28 = smov [#allocation8]  }
   0xb   :  { %15 = dma.vmem_to_smem %s13_s26, 16, %s2094_s28, [#allocation7] }
   0xc   :  { %2086 = dma.done.wait [#allocation7], 16 }
   0xd   :  { %2087 = vsyncadd [#allocation7], 4294967280 }
   0xe   :  { %17 = sfence }
   0xf   :  { %18 = vsyncpa [#allocation10], 0 }
  0x10   :  { %19 = vsyncpa [#allocation13], 0 }
  0x11   :  { %20 = vsyncpa [#allocation11], 0  ;;  %s1731_s29 = sld [smem:[#allocation8 + $0x1]]  ;;  %s2095_s30 = smov [#allocation12]  }
  0x12   :  { %s46_s8 = sshll.u32 %s2095_s30, 4  ;;  %s47_s8 = int_to_ptr.vmem [resolvable:$true] %s46_s8 }
  0x13   :  { %s2012_s0 = scalar_lea.vmem %s47_s8, 256  ;;  %p2017_p6 = scmp.lt.s32.totalorder %s47_s8, %s47_s8 }
  0x14   :  { %p2013_p5 = scmp.ne.s32.totalorder %s47_s8, %s2012_s0  ;;  %p2018_p7 = scmp.lt.s32.totalorder %s2012_s0, %s2012_s0 }
  0x16   :  { %p2019_p8 = por %p2018_p7, %p2017_p6 }
  0x18   :  { %p2020_p9 = pnand %p2019_p8, %p2013_p5 }
  0x1a   :  { %2023 = shalt.err (!%p2020_p9)
}
  0x1b   :  { %s2096_s9 = smov 128   ;;  %s2097_s10 = smov 8  }
  0x1c   :  { %52 = dma.hbm_to_vmem [thread:$0]  %s2838_s3, 256, %s47_s8, [#allocation13], %s2096_s9, %s2096_s9, %s2097_s10  }
  0x1d   :  { %s2098_s13 = smov [#allocation9]   ;;  %s2099_s15 = smov [#allocation14]  }
  0x1e   :  { %s34_s14 = sshll.u32 %s2098_s13, 4  ;;  %s60_s16 = sshll.u32 %s2099_s15, 4  ;;  %s61_s16 = int_to_ptr.vmem [resolvable:$true] %s60_s16  ;;  %s2162_s14 = int_to_ptr.vmem [resolvable:$true] %s34_s14 }
  0x1f   :  { %p1732_p10 = scmp.gt.s32.totalorder %s1731_s29, 0  ;;  %s2032_s17 = scalar_lea.vmem %s61_s16, 2048 }
  0x20   :  { %p2033_p11 = scmp.ne.s32.totalorder %s61_s16, %s2032_s17  ;;  %p2037_p12 = scmp.lt.s32.totalorder %s61_s16, %s61_s16 }
  0x21   :  { %s2844_s29 = smov (%p1732_p10, %s1731_s29), 0  ;;  %p2038_p13 = scmp.lt.s32.totalorder %s2032_s17, %s2032_s17 }
  0x23   :  { %p2039_p0 = por %p2038_p13, %p2037_p12 }
  0x25   :  { %p2040_p1 = pnand %p2039_p0, %p2033_p11 }
  0x27   :  { %2043 = shalt.err (!%p2040_p1)
}
  0x28   :  { %s2100_s18 = smov 256   ;;  %s2101_s19 = smov 16  }
  0x29   :  { %66 = dma.hbm_to_vmem [thread:$0]  %s2840_s5, 2048, %s61_s16, [#allocation13], %s2100_s18, %s2100_s18, %s2101_s19  }
  0x2a   :  { %s1776_s21 = sshll.u32 %s2844_s29, 10  ;;  %s2046_s28 = scalar_lea.hbm %s2837_s2, 1024 }
  0x2b   :  { %s33_s24 = scalar_lea.hbm %s2837_s2, %s1776_s21 }
  0x2c   :  { %s2044_s25 = scalar_lea.hbm %s33_s24, 1024  ;;  %p2047_p3 = scmp.lt.s32.totalorder %s33_s24, %s2837_s2 }
  0x2d   :  { %p2045_p2 = scmp.ne.s32.totalorder %s33_s24, %s2044_s25  ;;  %p2048_p4 = scmp.lt.s32.totalorder %s2046_s28, %s2044_s25 }
  0x2f   :  { %p2049_p5 = por %p2048_p4, %p2047_p3 }
  0x31   :  { %p2050_p6 = pnand %p2049_p5, %p2045_p2 }
  0x33   :  { %2053 = shalt.err (!%p2050_p6)
}
  0x34   :  { %s2054_s5 = scalar_lea.vmem %s2162_s14, 1024  ;;  %p2059_p8 = scmp.lt.s32.totalorder %s2162_s14, %s2162_s14 }
  0x35   :  { %p2055_p7 = scmp.ne.s32.totalorder %s2162_s14, %s2054_s5  ;;  %p2060_p9 = scmp.lt.s32.totalorder %s2054_s5, %s2054_s5 }
  0x37   :  { %p2061_p10 = por %p2060_p9, %p2059_p8 }
  0x39   :  { %p2062_p11 = pnand %p2061_p10, %p2055_p7 }
  0x3b   :  { %2065 = shalt.err (!%p2062_p11)
}
  0x3c   :  { %40 = dma.hbm_to_vmem [thread:$0]  %s33_s24, 1024, %s2162_s14, [#allocation10], %s2096_s9, %s2096_s9, %s2097_s10  }
  0x3d   :  { %2088 = dma.done.wait [#allocation10], 1024  }
  0x3e   :  { %2089 = vsyncadd [#allocation10], 4294966272 }
  0x3f   :  { %2090 = dma.done.wait [#allocation13], 2304  }
  0x40   :  { %2091 = vsyncadd [#allocation13], 4294964992  ;;  %vm87_vm0 = vcmask 261120   ;;  %s92_s2 = sld [smem:[#allocation8]]  ;;  %v2102_v0 = vmov 0.0  }
  0x41   :  { %88 = vst.msk [vmem:[#allocation3] sm:$0xff] %vm87_vm0, %v2102_v0  ;;  %89 = vst.msk [vmem:[#allocation4] sm:$0xff] %vm87_vm0, %v2102_v0 }
  0x42   :  { %90 = vst.msk [vmem:[#allocation5] sm:$0xff] %vm87_vm0, %v2102_v0  ;;  %91 = vst.msk [vmem:[#allocation6] sm:$0xff] %vm87_vm0, %v2102_v0 }
  0x46   :  { %p1736_p12 = scmp.le.s32.totalorder %s92_s2, 0 }
  0x47   :  { %s2103_s29 = smov (!%p1736_p12), 32   ;;  %s2106_s14 = smov (!%p1736_p12), 64  }
  0x48   :  { %96 = sbr.rel (%p1736_p12) target bundleno = 5744 (0x1670), region = 45  ;;  %s2107_s15 = smov (!%p1736_p12), 96  }
  0x4d   :  { %v2192_v1 = vld [vmem:[#allocation5] sm:$0xff]  ;;  %v2194_v2 = vld [vmem:[#allocation14 + $0x78] sm:$0xff]  ;;  %v2196_v3 = vld [vmem:[#allocation14 + $0x70] sm:$0xff]  ;;  %v2104_v8 = vmov 0.0   ;;  %vm140_vm1 = vcmask 130048   ;;  %vm288_vm2 = vcmask 523264  }
  0x4e   :  { %283 = vrot.lane.b32.xlu0 %v2192_v1, %s2103_s29  ;;  %308 = vmatprep.subr.mxu1 %v2194_v2  ;;  %v2201_v4 = vld [vmem:[#allocation14 + $0x68] sm:$0xff]  ;;  %v2203_v5 = vld [vmem:[#allocation14 + $0x60] sm:$0xff]  ;;  %v2206_v6 = vld [vmem:[#allocation14 + $0x58] sm:$0xff]  ;;  %v2105_v35 = vmov 0  }
  0x4f   :  { %309 = vmatpush1.msra.mxu1 %v2196_v3  ;;  %v132_v7 = vld [vmem:[#allocation12 + $0x8] sm:$0xff]  ;;  %356 = vmatprep.mubr.f32.mxu1 %v2104_v8  ;;  %v2210_v9 = vld [vmem:[#allocation14 + $0x50] sm:$0xff]  ;;  %v2213_v11 = vld [vmem:[#allocation14 + $0x48] sm:$0xff] }
  0x50   :  { %310 = vmatprep.subr.mxu1 %v2201_v4  ;;  %1796 = vmatprep.subr.mxu0 %v132_v7  ;;  %v131_v10 = vld [vmem:[#allocation12] sm:$0xff]  ;;  %v2216_v13 = vld [vmem:[#allocation14 + $0x40] sm:$0xff]  ;;  %v124_v14 = vld [vmem:[#allocation9 + $0x8] sm:$0xff] }
  0x51   :  { %311 = vmatpush1.msra.mxu1 %v2203_v5  ;;  %1797 = vmatpush3.msra.mxu0 %v132_v7  ;;  %v123_v12 = vld [vmem:[#allocation9] sm:$0xff]  ;;  %v2219_v15 = vld [vmem:[#allocation14 + $0x38] sm:$0xff]  ;;  %v2227_v17 = vld [vmem:[#allocation14 + $0x28] sm:$0xff] }
  0x52   :  { %312 = vmatprep.subr.mxu1 %v2206_v6  ;;  %1798 = vmatprep.subr.mxu0 %v131_v10  ;;  %v2223_v16 = vld [vmem:[#allocation14 + $0x30] sm:$0xff]  ;;  %v2230_v18 = vld [vmem:[#allocation14 + $0x20] sm:$0xff]  ;;  %v2234_v19 = vld [vmem:[#allocation14 + $0x18] sm:$0xff] }
  0x53   :  { %313 = vmatpush1.msra.mxu1 %v2210_v9  ;;  %1799 = vmatpush3.msra.mxu0 %v131_v10  ;;  %v2238_v20 = vld [vmem:[#allocation14 + $0x10] sm:$0xff]  ;;  %v2242_v21 = vld [vmem:[#allocation14 + $0x8] sm:$0xff]  ;;  %v2246_v22 = vld [vmem:[#allocation14] sm:$0xff] }
  0x54   :  { %314 = vmatprep.subr.mxu1 %v2213_v11  ;;  %1800 = vmatprep.mubr.msk.f32.mxu0 %vm140_vm1, %v123_v12  ;;  %v2265_v23 = vld [vmem:[#allocation3] sm:$0xff]  ;;  %v281_v37 = vld [vmem:[#allocation6] sm:$0xff]  ;;  %v279_v39 = vld [vmem:[#allocation4] sm:$0xff] }
  0x55   :  { %315 = vmatpush1.msra.mxu1 %v2216_v13  ;;  %1801 = vmatmul.mubr.msk.f32.vlgmr.msra.gmra.mxu0 %vm140_vm1, %v124_v14  ;;  %v2292_v27 = vld [vmem:[%s2839_s4] ss:$0 sm:$0xff]  ;;  %v125_v62 = vld [vmem:[#allocation9 + $0x10] sm:$0xff]  ;;  %v126_v63 = vld [vmem:[#allocation9 + $0x18] sm:$0xff] }
  0x56   :  { %316 = vmatprep.subr.mxu1 %v2219_v15  ;;  %478 = vmatprep.subr.mxu0 %v2194_v2  ;;  %v2298_v31 = vld [vmem:[%s2841_s6] ss:$0 sm:$0xff]  ;;  %v128_v10 = vld [vmem:[#allocation9 + $0x28] sm:$0xff]  ;;  %v129_v12 = vld [vmem:[#allocation9 + $0x30] sm:$0xff] }
  0x57   :  { %317 = vmatpush1.msra.mxu1 %v2223_v16  ;;  %479 = vmatpush1.msra.mxu0 %v2196_v3  ;;  %v2310_v46 = vld [vmem:[%s2836_s1] sm:$0xff] }
  0x58   :  { %318 = vmatprep.subr.mxu1 %v2227_v17  ;;  %480 = vmatprep.subr.mxu0 %v2201_v4  ;;  %vm408_vm3 = vcmp.gt.s32.totalorder %v2310_v46, 0  ;;  %vm571_vm6 = vcmp.gt.s32.totalorder %v2310_v46, 1  ;;  %vm727_vm9 = vcmp.gt.s32.totalorder %v2310_v46, 2  ;;  %vm883_vm12 = vcmp.gt.s32.totalorder %v2310_v46, 3 }
  0x59   :  { %319 = vmatpush1.msra.mxu1 %v2230_v18  ;;  %481 = vmatpush1.msra.mxu0 %v2203_v5  ;;  %v2315_v53 = vsel %vm408_vm3, 1, %v2105_v35  ;;  %vm1039_vm15 = vcmp.gt.s32.totalorder %v2310_v46, 4 }
  0x5a   :  { %320 = vmatprep.subr.mxu1 %v2234_v19  ;;  %482 = vmatprep.subr.mxu0 %v2206_v6 }
  0x5b   :  { %321 = vmatpush1.msra.mxu1 %v2238_v20  ;;  %483 = vmatpush1.msra.mxu0 %v2210_v9 }
  0x5c   :  { %322 = vmatprep.subr.mxu1 %v2242_v21  ;;  %484 = vmatprep.subr.mxu0 %v2213_v11 }
  0x5d   :  { %323 = vmatpush1.msra.mxu1 %v2246_v22  ;;  %485 = vmatpush1.msra.mxu0 %v2216_v13 }
  0x5e   :  { %486 = vmatprep.subr.mxu0 %v2219_v15  ;;  %634 = vmatprep.subr.mxu1 %v2194_v2 }
  0x5f   :  { %487 = vmatpush1.msra.mxu0 %v2223_v16  ;;  %1851 = vset.pattern.permute.xlu0 %v2105_v35 }
  0x60   :  { %488 = vmatprep.subr.mxu0 %v2227_v17  ;;  %1850 = vset.pattern.permute.xlu1 %v2105_v35 }
  0x61   :  { %489 = vmatpush1.msra.mxu0 %v2230_v18  ;;  %1803 = vmatprep.mubr.msk.f32.mxu0 %vm140_vm1, %v125_v62 }
  0x62   :  { %490 = vmatprep.subr.mxu0 %v2234_v19  ;;  %1804 = vmatmul.mubr.msk.f32.gmra.mxu0 %vm140_vm1, %v126_v63 }
  0x63   :  { %491 = vmatpush1.msra.mxu0 %v2238_v20 }
  0x64   :  { %492 = vmatprep.subr.mxu0 %v2242_v21 }
  0x65   :  { %493 = vmatpush1.msra.mxu0 %v2246_v22 }
  0x66   :  { %790 = vmatprep.subr.mxu0 %v2194_v2 }
  0xc0   :  { %v284_v24 = vpop.permute.xlu0 %283 }
  0xc1   :  { %v287_v25 = vsel %vm87_vm0, %v2265_v23, %v284_v24  ;;  %v130_v24 = vld [vmem:[#allocation9 + $0x38] sm:$0xff] }
  0xc2   :  { %1747 = vmatmul.mubr.msk.f32.vlgmr.msra.gmra.mxu1 %vm288_vm2, %v287_v25 }
  0xc3   :  { %635 = vmatpush1.msra.mxu1 %v2196_v3  ;;  %682 = vmatprep.mubr.f32.mxu1 %v2104_v8 }
  0xc4   :  { %636 = vmatprep.subr.mxu1 %v2201_v4 }
  0xc5   :  { %637 = vmatpush1.msra.mxu1 %v2203_v5 }
  0xc6   :  { %638 = vmatprep.subr.mxu1 %v2206_v6 }
  0xc7   :  { %639 = vmatpush1.msra.mxu1 %v2210_v9 }
  0xc8   :  { %640 = vmatprep.subr.mxu1 %v2213_v11 }
  0xc9   :  { %641 = vmatpush1.msra.mxu1 %v2216_v13 }
  0xca   :  { %642 = vmatprep.subr.mxu1 %v2219_v15 }
  0xcb   :  { %643 = vmatpush1.msra.mxu1 %v2223_v16 }
  0xcc   :  { %644 = vmatprep.subr.mxu1 %v2227_v17 }
  0xcd   :  { %645 = vmatpush1.msra.mxu1 %v2230_v18 }
  0xce   :  { %646 = vmatprep.subr.mxu1 %v2234_v19 }
  0xcf   :  { %647 = vmatpush1.msra.mxu1 %v2238_v20 }
  0xd0   :  { %648 = vmatprep.subr.mxu1 %v2242_v21 }
  0xd1   :  { %649 = vmatpush1.msra.mxu1 %v2246_v22 }
  0xd2   :  { %946 = vmatprep.subr.mxu1 %v2194_v2 }
 0x115   :  { %v2287_v26 = vpop.f32.mrf.mxu0 }
 0x117   :  { %v231_v28 = vpop.f32.mrf.mxu0 }
 0x118   :  { %v232_v29 = vadd.f32 %v2292_v27, %v231_v28 }
 0x182   :  { %v358_v30 = vpop.f32.mrf.mxu1 }
 0x183   :  { %v415_v32 = vadd.f32 %v358_v30, %v232_v29 }
 0x184   :  { %v360_v33 = vpop.f32.mrf.mxu1 }
 0x185   :  { %1852 = vtanh.f32 %v415_v32  ;;  %v374_v34 = vadd.f32 %v2298_v31, %v360_v33  ;;  %v1749_v40 = vmul.f32 -1.442695, %v415_v32 }
 0x187   :  { %1854 = vtanh.f32 %v374_v34  ;;  %v1748_v41 = vmul.f32 -1.442695, %v374_v34 }
 0x188   :  { %1856 = vpow2.f32 %v1749_v40 }
 0x189   :  { %1858 = vpow2.f32 %v1748_v41  ;;  %v2382_v41 = vpop.f32.mrf.mxu0 }
 0x192   :  { %v1853_v36 = vpop.eup %1852 }
 0x193   :  { %429 = vrot.lane.b32.xlu1 %v1853_v36, %s2103_s29 }
 0x194   :  { %v1855_v38 = vpop.eup %1854 }
 0x195   :  { %388 = vrot.lane.b32.xlu0 %v1855_v38, %s2103_s29  ;;  %v1857_v42 = vpop.eup %1856 }
 0x196   :  { %v1859_v43 = vpop.eup %1858  ;;  %v419_v44 = vadd.f32 1.0, %v1857_v42  ;;  %v2384_v42 = vpop.f32.mrf.mxu0 }
 0x197   :  { %383 = vrot.lane.b32.xlu1 %v281_v37, %s2103_s29  ;;  %v378_v45 = vadd.f32 1.0, %v1859_v43 }
 0x198   :  { %1860 = vrcp.f32 %v419_v44 }
 0x199   :  { %424 = vrot.lane.b32.xlu0 %v279_v39, %s2103_s29  ;;  %1862 = vrcp.f32 %v378_v45 }
 0x1a5   :  { %v1861_v47 = vpop.eup %1860 }
 0x1a6   :  { %v1863_v50 = vpop.eup %1862 }
 0x205   :  { %v430_v48 = vpop.permute.xlu1 %429 }
 0x206   :  { %v432_v49 = vmul.f32 %v1861_v47, %v430_v48  ;;  %v237_v48 = vadd.f32 %v2287_v26, %v2292_v27 }
 0x207   :  { %v389_v51 = vpop.permute.xlu0 %388 }
 0x208   :  { %434 = vrot.lane.b32.xlu0 %v432_v49, %s2103_s29  ;;  %v391_v52 = vmul.f32 %v1863_v50, %v389_v51 }
 0x209   :  { %v2324_v55 = vpop.permute.xlu1 %383 }
 0x20a   :  { %393 = vrot.lane.b32.xlu1 %v391_v52, %s2103_s29  ;;  %v386_v59 = vmul.f32 %v1863_v50, %v2324_v55 }
 0x20b   :  { %v2322_v54 = vpop.permute.xlu0 %424 }
 0x20c   :  { %411 = vperm.xlu0 %1851, %v2315_v53   ;;  %v427_v56 = vmul.f32 %v1861_v47, %v2322_v54 }
 0x20e   :  { %371 = vperm.xlu1 %1850, %v2105_v35  }
 0x210   :  { %403 = vrot.lane.b32.xlu0 %v2192_v1, %s2106_s14  ;;  %v127_v1 = vld [vmem:[#allocation9 + $0x20] sm:$0xff] }
 0x211   :  { %1806 = vmatprep.mubr.msk.f32.mxu0 %vm140_vm1, %v127_v1 }
 0x212   :  { %1807 = vmatmul.mubr.msk.f32.gmra.mxu0 %vm140_vm1, %v128_v10 }
 0x213   :  { %1809 = vmatprep.mubr.msk.f32.mxu0 %vm140_vm1, %v129_v12 }
 0x216   :  { %1810 = vmatmul.mubr.msk.f32.gmra.mxu0 %vm140_vm1, %v130_v24 }
 0x217   :  { %526 = vmatprep.mubr.f32.mxu0 %v2104_v8 }
 0x27a   :  { %v435_v57 = vpop.permute.xlu0 %434 }
 0x27b   :  { %v2327_v58 = vadd.f32 %v435_v57, %v427_v56 }
 0x27c   :  { %v394_v60 = vpop.permute.xlu1 %393 }
 0x27d   :  { %1864 = vtanh.f32 %v2327_v58  ;;  %v2331_v61 = vadd.f32 %v394_v60, %v386_v59 }
 0x27f   :  { %1866 = vtanh.f32 %v2331_v61 }
 0x287   :  { %v2347_v28 = vpop.permute.xlu0 %411 }
 0x288   :  { %vm413_vm5 = vcmp.eq.s32.totalorder %v2347_v28, 1 }
 0x289   :  { %v2345_v25 = vpop.permute.xlu1 %371 }
 0x28a   :  { %v1865_v7 = vpop.eup %1864  ;;  %vm373_vm4 = vcmp.eq.s32.totalorder %v2345_v25, 1 }
 0x28b   :  { %440 = vrot.lane.b32.xlu1 %v1865_v7, %s2103_s29  ;;  %v404_v32 = vpop.permute.xlu0 %403 }
 0x28c   :  { %v1867_v14 = vpop.eup %1866 }
 0x28f   :  { %399 = vrot.lane.b32.xlu1 %v1867_v14, %s2103_s29 }
 0x293   :  { %445 = vrot.lane.b32.xlu1 %v2265_v23, %s2106_s14 }
 0x2d2   :  { %v2386_v43 = vpop.f32.mrf.mxu0 }
 0x2d4   :  { %v2388_v44 = vpop.f32.mrf.mxu0 }
 0x2d6   :  { %v2390_v45 = vpop.f32.mrf.mxu0 }
 0x2fd   :  { %v441_v29 = vpop.permute.xlu1 %440 }
 0x2fe   :  { %v443_v34 = vmul.f32 %v1861_v47, %v441_v29  ;;  %v2392_v47 = vpop.f32.mrf.mxu0 }
 0x301   :  { %v400_v30 = vpop.permute.xlu1 %399 }
 0x302   :  { %v402_v33 = vmul.f32 %v1863_v50, %v400_v30  ;;  %v2402_v30 = vsel %vm571_vm6, 1, %v2105_v35 }
 0x304   :  { %v2352_v36 = vsel %vm373_vm4, %v402_v33, %v404_v32  ;;  %v2411_v32 = vsel %vm413_vm5, %v2327_v58, %v2322_v54 }
 0x305   :  { %v446_v37 = vpop.permute.xlu1 %445  ;;  %455 = vrot.lane.b32.xlu1 %v2352_v36, %s2107_s15 }
 0x306   :  { %v2359_v23 = vsel %vm413_vm5, %v443_v34, %v446_v37  ;;  %v2418_v37 = vsel %vm373_vm4, %v2331_v61, %v2324_v55  ;;  %vm1195_vm4 = vcmp.gt.s32.totalorder %v2310_v46, 5 }
 0x307   :  { %451 = vrot.lane.b32.xlu0 %v2359_v23, %s2106_s14 }
 0x377   :  { %v456_v38 = vpop.permute.xlu1 %455 }
 0x379   :  { %v452_v39 = vpop.permute.xlu0 %451 }
 0x37a   :  { %v458_v40 = vsel %vm87_vm0, %v452_v39, %v456_v38 }
 0x37b   :  { %1750 = vmatmul.mubr.msk.f32.vlgmr.msra.gmra.mxu0 %vm288_vm2, %v458_v40 }
 0x37c   :  { %791 = vmatpush1.msra.mxu0 %v2196_v3  ;;  %838 = vmatprep.mubr.f32.mxu0 %v2104_v8 }
 0x37d   :  { %792 = vmatprep.subr.mxu0 %v2201_v4 }
 0x37e   :  { %793 = vmatpush1.msra.mxu0 %v2203_v5 }
 0x37f   :  { %794 = vmatprep.subr.mxu0 %v2206_v6 }
 0x380   :  { %795 = vmatpush1.msra.mxu0 %v2210_v9 }
 0x381   :  { %796 = vmatprep.subr.mxu0 %v2213_v11 }
 0x382   :  { %797 = vmatpush1.msra.mxu0 %v2216_v13 }
 0x383   :  { %798 = vmatprep.subr.mxu0 %v2219_v15 }
 0x384   :  { %799 = vmatpush1.msra.mxu0 %v2223_v16 }
 0x385   :  { %800 = vmatprep.subr.mxu0 %v2227_v17 }
 0x386   :  { %801 = vmatpush1.msra.mxu0 %v2230_v18 }
 0x387   :  { %802 = vmatprep.subr.mxu0 %v2234_v19 }
 0x388   :  { %803 = vmatpush1.msra.mxu0 %v2238_v20 }
 0x389   :  { %804 = vmatprep.subr.mxu0 %v2242_v21 }
 0x38a   :  { %805 = vmatpush1.msra.mxu0 %v2246_v22 }
 0x38b   :  { %1102 = vmatprep.subr.mxu0 %v2194_v2 }
 0x43b   :  { %v528_v49 = vpop.f32.mrf.mxu0 }
 0x43c   :  { %v579_v50 = vadd.f32 %v528_v49, %v237_v48 }
 0x43d   :  { %v530_v51 = vpop.f32.mrf.mxu0 }
 0x43e   :  { %1868 = vtanh.f32 %v579_v50  ;;  %v544_v52 = vadd.f32 %v2298_v31, %v530_v51  ;;  %v1752_v59 = vmul.f32 -1.442695, %v579_v50 }
 0x440   :  { %1870 = vtanh.f32 %v544_v52  ;;  %v1751_v60 = vmul.f32 -1.442695, %v544_v52 }
 0x441   :  { %1872 = vpow2.f32 %v1752_v59 }
 0x442   :  { %1874 = vpow2.f32 %v1751_v60 }
 0x44b   :  { %v1869_v56 = vpop.eup %1868 }
 0x44c   :  { %589 = vrot.lane.b32.xlu1 %v1869_v56, %s2103_s29 }
 0x44d   :  { %v1871_v57 = vpop.eup %1870 }
 0x44e   :  { %554 = vrot.lane.b32.xlu0 %v1871_v57, %s2103_s29  ;;  %v1873_v62 = vpop.eup %1872 }
 0x44f   :  { %v1875_v63 = vpop.eup %1874  ;;  %v583_v26 = vadd.f32 1.0, %v1873_v62 }
 0x450   :  { %v548_v1 = vadd.f32 1.0, %v1875_v63 }
 0x451   :  { %1876 = vrcp.f32 %v583_v26 }
 0x452   :  { %1878 = vrcp.f32 %v548_v1 }
 0x45e   :  { %v1877_v7 = vpop.eup %1876 }
 0x45f   :  { %v1879_v14 = vpop.eup %1878  ;;  %v587_v33 = vmul.f32 %v1877_v7, %v2411_v32 }
 0x460   :  { %v552_v39 = vmul.f32 %v1879_v14, %v2418_v37 }
 0x4be   :  { %v590_v10 = vpop.permute.xlu1 %589 }
 0x4bf   :  { %v592_v12 = vmul.f32 %v1877_v7, %v590_v10 }
 0x4c0   :  { %v555_v24 = vpop.permute.xlu0 %554 }
 0x4c1   :  { %594 = vrot.lane.b32.xlu1 %v592_v12, %s2103_s29  ;;  %v557_v29 = vmul.f32 %v1879_v14, %v555_v24 }
 0x4c3   :  { %559 = vrot.lane.b32.xlu0 %v557_v29, %s2103_s29 }
 0x4c5   :  { %574 = vperm.xlu1 %1850, %v2402_v30  }
 0x4c7   :  { %541 = vperm.xlu0 %1851, %v2315_v53  }
 0x533   :  { %v595_v34 = vpop.permute.xlu1 %594 }
 0x534   :  { %v2420_v38 = vadd.f32 %v595_v34, %v587_v33 }
 0x535   :  { %v560_v53 = vpop.permute.xlu0 %559 }
 0x536   :  { %1880 = vtanh.f32 %v2420_v38  ;;  %v2424_v40 = vadd.f32 %v560_v53, %v552_v39 }
 0x538   :  { %1882 = vtanh.f32 %v2424_v40 }
 0x540   :  { %v2429_v25 = vpop.permute.xlu1 %574 }
 0x541   :  { %vm576_vm7 = vcmp.eq.s32.totalorder %v2429_v25, 1 }
 0x542   :  { %v2431_v55 = vpop.permute.xlu0 %541 }
 0x543   :  { %v1881_v54 = vpop.eup %1880  ;;  %vm543_vm8 = vcmp.eq.s32.totalorder %v2431_v55, 1 }
 0x544   :  { %600 = vrot.lane.b32.xlu1 %v1881_v54, %s2103_s29  ;;  %v2476_v54 = vsel %vm727_vm9, 1, %v2105_v35 }
 0x545   :  { %v1883_v58 = vpop.eup %1882 }
 0x546   :  { %565 = vrot.lane.b32.xlu0 %v1883_v58, %s2103_s29  ;;  %v2485_v58 = vsel %vm576_vm7, %v2420_v38, %v2411_v32 }
 0x5b6   :  { %v601_v61 = vpop.permute.xlu1 %600 }
 0x5b7   :  { %v603_v28 = vmul.f32 %v1877_v7, %v601_v61 }
 0x5b8   :  { %v566_v48 = vpop.permute.xlu0 %565 }
 0x5b9   :  { %v2437_v49 = vsel %vm576_vm7, %v603_v28, %v2359_v23  ;;  %v568_v50 = vmul.f32 %v1879_v14, %v566_v48  ;;  %v2492_v48 = vsel %vm543_vm8, %v2424_v40, %v2418_v37  ;;  %vm1351_vm7 = vcmp.gt.s32.totalorder %v2310_v46, 6 }
 0x5ba   :  { %607 = vrot.lane.b32.xlu0 %v2437_v49, %s2106_s14 }
 0x5bb   :  { %v2445_v51 = vsel %vm543_vm8, %v568_v50, %v2352_v36  ;;  %v242_v36 = vadd.f32 %v2292_v27, %v2384_v42 }
 0x5bc   :  { %611 = vrot.lane.b32.xlu1 %v2445_v51, %s2107_s15 }
 0x62c   :  { %v608_v52 = vpop.permute.xlu0 %607 }
 0x62e   :  { %v612_v56 = vpop.permute.xlu1 %611 }
 0x62f   :  { %v614_v57 = vsel %vm87_vm0, %v608_v52, %v612_v56 }
 0x630   :  { %1753 = vmatmul.mubr.msk.f32.vlgmr.msra.gmra.mxu1 %vm288_vm2, %v614_v57 }
 0x631   :  { %947 = vmatpush1.msra.mxu1 %v2196_v3  ;;  %994 = vmatprep.mubr.f32.mxu1 %v2104_v8 }
 0x632   :  { %948 = vmatprep.subr.mxu1 %v2201_v4 }
 0x633   :  { %949 = vmatpush1.msra.mxu1 %v2203_v5 }
 0x634   :  { %950 = vmatprep.subr.mxu1 %v2206_v6 }
 0x635   :  { %951 = vmatpush1.msra.mxu1 %v2210_v9 }
 0x636   :  { %952 = vmatprep.subr.mxu1 %v2213_v11 }
 0x637   :  { %953 = vmatpush1.msra.mxu1 %v2216_v13 }
 0x638   :  { %954 = vmatprep.subr.mxu1 %v2219_v15 }
 0x639   :  { %955 = vmatpush1.msra.mxu1 %v2223_v16 }
 0x63a   :  { %956 = vmatprep.subr.mxu1 %v2227_v17 }
 0x63b   :  { %957 = vmatpush1.msra.mxu1 %v2230_v18 }
 0x63c   :  { %958 = vmatprep.subr.mxu1 %v2234_v19 }
 0x63d   :  { %959 = vmatpush1.msra.mxu1 %v2238_v20 }
 0x63e   :  { %960 = vmatprep.subr.mxu1 %v2242_v21 }
 0x63f   :  { %961 = vmatpush1.msra.mxu1 %v2246_v22 }
 0x640   :  { %1258 = vmatprep.subr.mxu1 %v2194_v2 }
 0x6f0   :  { %v684_v23 = vpop.f32.mrf.mxu1 }
 0x6f1   :  { %v735_v59 = vadd.f32 %v684_v23, %v242_v36 }
 0x6f2   :  { %v686_v60 = vpop.f32.mrf.mxu1 }
 0x6f3   :  { %1884 = vtanh.f32 %v735_v59  ;;  %v700_v62 = vadd.f32 %v2298_v31, %v686_v60  ;;  %v1755_v1 = vmul.f32 -1.442695, %v735_v59 }
 0x6f5   :  { %1886 = vtanh.f32 %v700_v62  ;;  %v1754_v7 = vmul.f32 -1.442695, %v700_v62 }
 0x6f6   :  { %1888 = vpow2.f32 %v1755_v1 }
 0x6f7   :  { %1890 = vpow2.f32 %v1754_v7 }
 0x700   :  { %v1885_v63 = vpop.eup %1884 }
 0x701   :  { %745 = vrot.lane.b32.xlu1 %v1885_v63, %s2103_s29 }
 0x702   :  { %v1887_v26 = vpop.eup %1886 }
 0x703   :  { %710 = vrot.lane.b32.xlu0 %v1887_v26, %s2103_s29  ;;  %v1889_v10 = vpop.eup %1888 }
 0x704   :  { %v1891_v12 = vpop.eup %1890  ;;  %v739_v42 = vadd.f32 1.0, %v1889_v10 }
 0x705   :  { %v704_v14 = vadd.f32 1.0, %v1891_v12 }
 0x706   :  { %1892 = vrcp.f32 %v739_v42 }
 0x707   :  { %1894 = vrcp.f32 %v704_v14 }
 0x713   :  { %v1893_v24 = vpop.eup %1892 }
 0x714   :  { %v1895_v34 = vpop.eup %1894  ;;  %v743_v61 = vmul.f32 %v1893_v24, %v2485_v58 }
 0x715   :  { %v708_v52 = vmul.f32 %v1895_v34, %v2492_v48 }
 0x773   :  { %v746_v29 = vpop.permute.xlu1 %745 }
 0x774   :  { %v748_v33 = vmul.f32 %v1893_v24, %v746_v29 }
 0x775   :  { %v711_v39 = vpop.permute.xlu0 %710 }
 0x776   :  { %750 = vrot.lane.b32.xlu1 %v748_v33, %s2103_s29  ;;  %v713_v53 = vmul.f32 %v1895_v34, %v711_v39 }
 0x778   :  { %715 = vrot.lane.b32.xlu0 %v713_v53, %s2103_s29 }
 0x77a   :  { %730 = vperm.xlu1 %1850, %v2476_v54  }
 0x77c   :  { %697 = vperm.xlu0 %1851, %v2402_v30  }
 0x7e8   :  { %v751_v28 = vpop.permute.xlu1 %750 }
 0x7e9   :  { %v2494_v50 = vadd.f32 %v751_v28, %v743_v61 }
 0x7ea   :  { %v716_v30 = vpop.permute.xlu0 %715 }
 0x7eb   :  { %1896 = vtanh.f32 %v2494_v50  ;;  %v2498_v56 = vadd.f32 %v716_v30, %v708_v52  ;;  %v2550_v52 = vsel %vm883_vm12, 1, %v2105_v35 }
 0x7ed   :  { %1898 = vtanh.f32 %v2498_v56 }
 0x7f5   :  { %v2503_v25 = vpop.permute.xlu1 %730 }
 0x7f6   :  { %vm732_vm10 = vcmp.eq.s32.totalorder %v2503_v25, 1 }
 0x7f7   :  { %v2505_v37 = vpop.permute.xlu0 %697  ;;  %v2559_v30 = vsel %vm732_vm10, %v2494_v50, %v2485_v58 }
 0x7f8   :  { %v1897_v32 = vpop.eup %1896  ;;  %vm699_vm11 = vcmp.eq.s32.totalorder %v2505_v37, 1 }
 0x7f9   :  { %756 = vrot.lane.b32.xlu1 %v1897_v32, %s2103_s29 }
 0x7fa   :  { %v1899_v38 = vpop.eup %1898 }
 0x7fb   :  { %721 = vrot.lane.b32.xlu0 %v1899_v38, %s2103_s29 }
 0x86b   :  { %v757_v40 = vpop.permute.xlu1 %756 }
 0x86c   :  { %v759_v55 = vmul.f32 %v1893_v24, %v757_v40  ;;  %v2566_v40 = vsel %vm699_vm11, %v2498_v56, %v2492_v48 }
 0x86d   :  { %v722_v57 = vpop.permute.xlu0 %721 }
 0x86e   :  { %v2511_v36 = vsel %vm732_vm10, %v759_v55, %v2437_v49  ;;  %v724_v23 = vmul.f32 %v1895_v34, %v722_v57  ;;  %v247_v49 = vadd.f32 %v2382_v41, %v2292_v27 }
 0x86f   :  { %763 = vrot.lane.b32.xlu0 %v2511_v36, %s2106_s14 }
 0x870   :  { %v2519_v59 = vsel %vm699_vm11, %v724_v23, %v2445_v51 }
 0x871   :  { %767 = vrot.lane.b32.xlu1 %v2519_v59, %s2107_s15 }
 0x8e1   :  { %v764_v60 = vpop.permute.xlu0 %763 }
 0x8e3   :  { %v768_v62 = vpop.permute.xlu1 %767 }
 0x8e4   :  { %v770_v63 = vsel %vm87_vm0, %v764_v60, %v768_v62 }
 0x8e5   :  { %1756 = vmatmul.mubr.msk.f32.vlgmr.msra.gmra.mxu0 %vm288_vm2, %v770_v63 }
 0x8e6   :  { %1103 = vmatpush1.msra.mxu0 %v2196_v3  ;;  %1150 = vmatprep.mubr.f32.mxu0 %v2104_v8 }
 0x8e7   :  { %1104 = vmatprep.subr.mxu0 %v2201_v4 }
 0x8e8   :  { %1105 = vmatpush1.msra.mxu0 %v2203_v5 }
 0x8e9   :  { %1106 = vmatprep.subr.mxu0 %v2206_v6 }
 0x8ea   :  { %1107 = vmatpush1.msra.mxu0 %v2210_v9 }
 0x8eb   :  { %1108 = vmatprep.subr.mxu0 %v2213_v11 }
 0x8ec   :  { %1109 = vmatpush1.msra.mxu0 %v2216_v13 }
 0x8ed   :  { %1110 = vmatprep.subr.mxu0 %v2219_v15 }
 0x8ee   :  { %1111 = vmatpush1.msra.mxu0 %v2223_v16 }
 0x8ef   :  { %1112 = vmatprep.subr.mxu0 %v2227_v17 }
 0x8f0   :  { %1113 = vmatpush1.msra.mxu0 %v2230_v18 }
 0x8f1   :  { %1114 = vmatprep.subr.mxu0 %v2234_v19 }
 0x8f2   :  { %1115 = vmatpush1.msra.mxu0 %v2238_v20 }
 0x8f3   :  { %1116 = vmatprep.subr.mxu0 %v2242_v21 }
 0x8f4   :  { %1117 = vmatpush1.msra.mxu0 %v2246_v22 }
 0x8f5   :  { %1414 = vmatprep.subr.mxu0 %v2194_v2 }
 0x9a5   :  { %v840_v51 = vpop.f32.mrf.mxu0 }
 0x9a6   :  { %v891_v26 = vadd.f32 %v840_v51, %v247_v49 }
 0x9a7   :  { %v842_v1 = vpop.f32.mrf.mxu0 }
 0x9a8   :  { %1900 = vtanh.f32 %v891_v26  ;;  %v856_v7 = vadd.f32 %v2298_v31, %v842_v1  ;;  %v1758_v42 = vmul.f32 -1.442695, %v891_v26 }
 0x9aa   :  { %1902 = vtanh.f32 %v856_v7  ;;  %v1757_v14 = vmul.f32 -1.442695, %v856_v7 }
 0x9ab   :  { %1904 = vpow2.f32 %v1758_v42 }
 0x9ac   :  { %1906 = vpow2.f32 %v1757_v14 }
 0x9b5   :  { %v1901_v10 = vpop.eup %1900 }
 0x9b6   :  { %901 = vrot.lane.b32.xlu1 %v1901_v10, %s2103_s29 }
 0x9b7   :  { %v1903_v12 = vpop.eup %1902 }
 0x9b8   :  { %866 = vrot.lane.b32.xlu0 %v1903_v12, %s2103_s29  ;;  %v1905_v2 = vpop.eup %1904 }
 0x9b9   :  { %v1907_v24 = vpop.eup %1906  ;;  %v895_v41 = vadd.f32 1.0, %v1905_v2 }
 0x9ba   :  { %v860_v29 = vadd.f32 1.0, %v1907_v24 }
 0x9bb   :  { %1908 = vrcp.f32 %v895_v41 }
 0x9bc   :  { %1910 = vrcp.f32 %v860_v29 }
 0x9c8   :  { %v1909_v33 = vpop.eup %1908 }
 0x9c9   :  { %v1911_v53 = vpop.eup %1910  ;;  %v899_v32 = vmul.f32 %v1909_v33, %v2559_v30 }
 0x9ca   :  { %v864_v57 = vmul.f32 %v1911_v53, %v2566_v40 }
 0xa28   :  { %v902_v34 = vpop.permute.xlu1 %901 }
 0xa29   :  { %v904_v39 = vmul.f32 %v1909_v33, %v902_v34 }
 0xa2a   :  { %v867_v61 = vpop.permute.xlu0 %866 }
 0xa2b   :  { %906 = vrot.lane.b32.xlu1 %v904_v39, %s2103_s29  ;;  %v869_v28 = vmul.f32 %v1911_v53, %v867_v61 }
 0xa2d   :  { %871 = vrot.lane.b32.xlu0 %v869_v28, %s2103_s29 }
 0xa2f   :  { %886 = vperm.xlu1 %1850, %v2550_v52  }
 0xa31   :  { %853 = vperm.xlu0 %1851, %v2476_v54  }
 0xa9d   :  { %v907_v38 = vpop.permute.xlu1 %906 }
 0xa9e   :  { %v2568_v55 = vadd.f32 %v907_v38, %v899_v32  ;;  %v2623_v38 = vsel %vm1039_vm15, 1, %v2105_v35 }
 0xa9f   :  { %v872_v54 = vpop.permute.xlu0 %871 }
 0xaa0   :  { %1912 = vtanh.f32 %v2568_v55  ;;  %v2572_v23 = vadd.f32 %v872_v54, %v864_v57 }
 0xaa2   :  { %1914 = vtanh.f32 %v2572_v23 }
 0xaaa   :  { %v2577_v25 = vpop.permute.xlu1 %886 }
 0xaab   :  { %vm888_vm13 = vcmp.eq.s32.totalorder %v2577_v25, 1 }
 0xaac   :  { %v2579_v48 = vpop.permute.xlu0 %853  ;;  %v2632_v57 = vsel %vm888_vm13, %v2568_v55, %v2559_v30 }
 0xaad   :  { %v1913_v58 = vpop.eup %1912  ;;  %vm855_vm14 = vcmp.eq.s32.totalorder %v2579_v48, 1 }
 0xaae   :  { %912 = vrot.lane.b32.xlu1 %v1913_v58, %s2103_s29 }
 0xaaf   :  { %v1915_v50 = vpop.eup %1914 }
 0xab0   :  { %877 = vrot.lane.b32.xlu0 %v1915_v50, %s2103_s29  ;;  %v2639_v50 = vsel %vm855_vm14, %v2572_v23, %v2566_v40 }
 0xb20   :  { %v913_v56 = vpop.permute.xlu1 %912 }
 0xb21   :  { %v915_v37 = vmul.f32 %v1909_v33, %v913_v56 }
 0xb22   :  { %v878_v60 = vpop.permute.xlu0 %877 }
 0xb23   :  { %v2585_v62 = vsel %vm888_vm13, %v915_v37, %v2511_v36  ;;  %v880_v63 = vmul.f32 %v1911_v53, %v878_v60  ;;  %v252_v36 = vadd.f32 %v2292_v27, %v2388_v44 }
 0xb24   :  { %919 = vrot.lane.b32.xlu0 %v2585_v62, %s2106_s14 }
 0xb25   :  { %v2593_v49 = vsel %vm855_vm14, %v880_v63, %v2519_v59 }
 0xb26   :  { %923 = vrot.lane.b32.xlu1 %v2593_v49, %s2107_s15 }
 0xb96   :  { %v920_v51 = vpop.permute.xlu0 %919 }
 0xb98   :  { %v924_v26 = vpop.permute.xlu1 %923 }
 0xb99   :  { %v926_v1 = vsel %vm87_vm0, %v920_v51, %v924_v26 }
 0xb9a   :  { %1759 = vmatmul.mubr.msk.f32.vlgmr.msra.gmra.mxu1 %vm288_vm2, %v926_v1 }
 0xb9b   :  { %1259 = vmatpush1.msra.mxu1 %v2196_v3  ;;  %1306 = vmatprep.mubr.f32.mxu1 %v2104_v8 }
 0xb9c   :  { %1260 = vmatprep.subr.mxu1 %v2201_v4 }
 0xb9d   :  { %1261 = vmatpush1.msra.mxu1 %v2203_v5 }
 0xb9e   :  { %1262 = vmatprep.subr.mxu1 %v2206_v6 }
 0xb9f   :  { %1263 = vmatpush1.msra.mxu1 %v2210_v9 }
 0xba0   :  { %1264 = vmatprep.subr.mxu1 %v2213_v11 }
 0xba1   :  { %1265 = vmatpush1.msra.mxu1 %v2216_v13 }
 0xba2   :  { %1266 = vmatprep.subr.mxu1 %v2219_v15 }
 0xba3   :  { %1267 = vmatpush1.msra.mxu1 %v2223_v16 }
 0xba4   :  { %1268 = vmatprep.subr.mxu1 %v2227_v17 }
 0xba5   :  { %1269 = vmatpush1.msra.mxu1 %v2230_v18 }
 0xba6   :  { %1270 = vmatprep.subr.mxu1 %v2234_v19 }
 0xba7   :  { %1271 = vmatpush1.msra.mxu1 %v2238_v20 }
 0xba8   :  { %1272 = vmatprep.subr.mxu1 %v2242_v21 }
 0xba9   :  { %1273 = vmatpush1.msra.mxu1 %v2246_v22 }
 0xc5a   :  { %v996_v59 = vpop.f32.mrf.mxu1 }
 0xc5b   :  { %v1047_v7 = vadd.f32 %v996_v59, %v252_v36 }
 0xc5c   :  { %v998_v10 = vpop.f32.mrf.mxu1 }
 0xc5d   :  { %1916 = vtanh.f32 %v1047_v7  ;;  %v1012_v12 = vadd.f32 %v2298_v31, %v998_v10  ;;  %v1761_v2 = vmul.f32 -1.442695, %v1047_v7  ;;  %v2696_v10 = vsel %vm1195_vm4, 1, %v2105_v35 }
 0xc5f   :  { %1918 = vtanh.f32 %v1012_v12  ;;  %v1760_v24 = vmul.f32 -1.442695, %v1012_v12 }
 0xc60   :  { %1920 = vpow2.f32 %v1761_v2 }
 0xc61   :  { %1922 = vpow2.f32 %v1760_v24 }
 0xc6a   :  { %v1917_v42 = vpop.eup %1916 }
 0xc6b   :  { %1057 = vrot.lane.b32.xlu1 %v1917_v42, %s2103_s29 }
 0xc6c   :  { %v1919_v14 = vpop.eup %1918 }
 0xc6d   :  { %1022 = vrot.lane.b32.xlu0 %v1919_v14, %s2103_s29  ;;  %v1921_v41 = vpop.eup %1920 }
 0xc6e   :  { %v1923_v29 = vpop.eup %1922  ;;  %v1051_v44 = vadd.f32 1.0, %v1921_v41 }
 0xc6f   :  { %v1016_v33 = vadd.f32 1.0, %v1923_v29 }
 0xc70   :  { %1924 = vrcp.f32 %v1051_v44 }
 0xc71   :  { %1926 = vrcp.f32 %v1016_v33 }
 0xc7d   :  { %v1925_v34 = vpop.eup %1924 }
 0xc7e   :  { %v1927_v61 = vpop.eup %1926  ;;  %v1055_v54 = vmul.f32 %v1925_v34, %v2632_v57 }
 0xc7f   :  { %v1020_v37 = vmul.f32 %v1927_v61, %v2639_v50 }
 0xcdd   :  { %v1058_v39 = vpop.permute.xlu1 %1057 }
 0xcde   :  { %v1060_v53 = vmul.f32 %v1925_v34, %v1058_v39 }
 0xcdf   :  { %v1023_v28 = vpop.permute.xlu0 %1022 }
 0xce0   :  { %1062 = vrot.lane.b32.xlu1 %v1060_v53, %s2103_s29  ;;  %v1025_v32 = vmul.f32 %v1927_v61, %v1023_v28 }
 0xce2   :  { %1027 = vrot.lane.b32.xlu0 %v1025_v32, %s2103_s29 }
 0xce4   :  { %1042 = vperm.xlu1 %1850, %v2623_v38  }
 0xce6   :  { %1009 = vperm.xlu0 %1851, %v2550_v52  }
 0xd52   :  { %v1063_v58 = vpop.permute.xlu1 %1062 }
 0xd53   :  { %v2641_v56 = vadd.f32 %v1063_v58, %v1055_v54 }
 0xd54   :  { %v1028_v52 = vpop.permute.xlu0 %1027 }
 0xd55   :  { %1928 = vtanh.f32 %v2641_v56  ;;  %v2645_v60 = vadd.f32 %v1028_v52, %v1020_v37  ;;  %v262_v37 = vadd.f32 %v2292_v27, %v2392_v47 }
 0xd57   :  { %1930 = vtanh.f32 %v2645_v60 }
 0xd5f   :  { %v2650_v25 = vpop.permute.xlu1 %1042 }
 0xd60   :  { %vm1044_vm1 = vcmp.eq.s32.totalorder %v2650_v25, 1 }
 0xd61   :  { %v2652_v40 = vpop.permute.xlu0 %1009  ;;  %v2705_v12 = vsel %vm1044_vm1, %v2641_v56, %v2632_v57 }
 0xd62   :  { %v1929_v30 = vpop.eup %1928  ;;  %vm1011_vm3 = vcmp.eq.s32.totalorder %v2652_v40, 1 }
 0xd63   :  { %1068 = vrot.lane.b32.xlu1 %v1929_v30, %s2103_s29  ;;  %v2712_v2 = vsel %vm1011_vm3, %v2645_v60, %v2639_v50 }
 0xd64   :  { %v1931_v55 = vpop.eup %1930 }
 0xd65   :  { %1033 = vrot.lane.b32.xlu0 %v1931_v55, %s2103_s29 }
 0xdd5   :  { %v1069_v23 = vpop.permute.xlu1 %1068 }
 0xdd6   :  { %v1071_v48 = vmul.f32 %v1925_v34, %v1069_v23 }
 0xdd7   :  { %v1034_v63 = vpop.permute.xlu0 %1033 }
 0xdd8   :  { %v2658_v51 = vsel %vm1044_vm1, %v1071_v48, %v2585_v62  ;;  %v1036_v26 = vmul.f32 %v1927_v61, %v1034_v63 }
 0xdd9   :  { %1075 = vrot.lane.b32.xlu0 %v2658_v51, %s2106_s14 }
 0xdda   :  { %v2666_v1 = vsel %vm1011_vm3, %v1036_v26, %v2593_v49 }
 0xddb   :  { %1079 = vrot.lane.b32.xlu1 %v2666_v1, %s2107_s15 }
 0xe4b   :  { %v1076_v36 = vpop.permute.xlu0 %1075 }
 0xe4d   :  { %v1080_v59 = vpop.permute.xlu1 %1079 }
 0xe4e   :  { %v1082_v7 = vsel %vm87_vm0, %v1076_v36, %v1080_v59 }
 0xe4f   :  { %1762 = vmatmul.mubr.msk.f32.vlgmr.msra.gmra.mxu0 %vm288_vm2, %v1082_v7 }
 0xe50   :  { %1415 = vmatpush1.msra.mxu0 %v2196_v3  ;;  %1462 = vmatprep.mubr.f32.mxu0 %v2104_v8  ;;  %v257_v3 = vadd.f32 %v2386_v43, %v2292_v27 }
 0xe51   :  { %1416 = vmatprep.subr.mxu0 %v2201_v4 }
 0xe52   :  { %1417 = vmatpush1.msra.mxu0 %v2203_v5 }
 0xe53   :  { %1418 = vmatprep.subr.mxu0 %v2206_v6 }
 0xe54   :  { %1419 = vmatpush1.msra.mxu0 %v2210_v9 }
 0xe55   :  { %1420 = vmatprep.subr.mxu0 %v2213_v11 }
 0xe56   :  { %1421 = vmatpush1.msra.mxu0 %v2216_v13 }
 0xe57   :  { %1422 = vmatprep.subr.mxu0 %v2219_v15 }
 0xe58   :  { %1423 = vmatpush1.msra.mxu0 %v2223_v16 }
 0xe59   :  { %1424 = vmatprep.subr.mxu0 %v2227_v17 }
 0xe5a   :  { %1425 = vmatpush1.msra.mxu0 %v2230_v18 }
 0xe5b   :  { %1426 = vmatprep.subr.mxu0 %v2234_v19 }
 0xe5c   :  { %1427 = vmatpush1.msra.mxu0 %v2238_v20 }
 0xe5d   :  { %1428 = vmatprep.subr.mxu0 %v2242_v21 }
 0xe5e   :  { %1429 = vmatpush1.msra.mxu0 %v2246_v22 }
 0xf0f   :  { %v1152_v4 = vpop.f32.mrf.mxu0 }
 0xf10   :  { %v1203_v5 = vadd.f32 %v1152_v4, %v257_v3  ;;  %v2739_v3 = vsel %vm1351_vm7, 1, %v2105_v35 }
 0xf11   :  { %v1154_v6 = vpop.f32.mrf.mxu0 }
 0xf12   :  { %1932 = vtanh.f32 %v1203_v5  ;;  %v1168_v8 = vadd.f32 %v2298_v31, %v1154_v6  ;;  %v1764_v13 = vmul.f32 -1.442695, %v1203_v5 }
 0xf14   :  { %1934 = vtanh.f32 %v1168_v8  ;;  %v1763_v15 = vmul.f32 -1.442695, %v1168_v8 }
 0xf15   :  { %1936 = vpow2.f32 %v1764_v13 }
 0xf16   :  { %1938 = vpow2.f32 %v1763_v15 }
 0xf1f   :  { %v1933_v9 = vpop.eup %1932 }
 0xf20   :  { %1213 = vrot.lane.b32.xlu1 %v1933_v9, %s2103_s29 }
 0xf21   :  { %v1935_v11 = vpop.eup %1934 }
 0xf22   :  { %1178 = vrot.lane.b32.xlu0 %v1935_v11, %s2103_s29  ;;  %v1937_v16 = vpop.eup %1936 }
 0xf23   :  { %v1939_v17 = vpop.eup %1938  ;;  %v1207_v18 = vadd.f32 1.0, %v1937_v16 }
 0xf24   :  { %v1172_v19 = vadd.f32 1.0, %v1939_v17 }
 0xf25   :  { %1940 = vrcp.f32 %v1207_v18 }
 0xf26   :  { %1942 = vrcp.f32 %v1172_v19 }
 0xf32   :  { %v1941_v20 = vpop.eup %1940 }
 0xf33   :  { %v1943_v43 = vpop.eup %1942  ;;  %v1211_v42 = vmul.f32 %v1941_v20, %v2705_v12 }
 0xf34   :  { %v1176_v41 = vmul.f32 %v1943_v43, %v2712_v2 }
 0xf92   :  { %v1214_v21 = vpop.permute.xlu1 %1213 }
 0xf93   :  { %v1216_v22 = vmul.f32 %v1941_v20, %v1214_v21 }
 0xf94   :  { %v1179_v62 = vpop.permute.xlu0 %1178 }
 0xf95   :  { %1218 = vrot.lane.b32.xlu1 %v1216_v22, %s2103_s29  ;;  %v1181_v49 = vmul.f32 %v1943_v43, %v1179_v62 }
 0xf97   :  { %1183 = vrot.lane.b32.xlu0 %v1181_v49, %s2103_s29 }
 0xf99   :  { %1198 = vperm.xlu1 %1850, %v2696_v10  }
 0xf9b   :  { %1165 = vperm.xlu0 %1851, %v2623_v38  }
0x1007   :  { %v1219_v14 = vpop.permute.xlu1 %1218 }
0x1008   :  { %v1221_v24 = vadd.f32 %v1219_v14, %v1211_v42  ;;  %v1980_v42 = vld [vmem:[%s2839_s4] ss:$0 sm:$0xff] }
0x1009   :  { %v1184_v29 = vpop.permute.xlu0 %1183  ;;  %v267_v14 = vadd.f32 %v1980_v42, %v2390_v45 }
0x100a   :  { %1944 = vtanh.f32 %v1221_v24  ;;  %v1186_v44 = vadd.f32 %v1184_v29, %v1176_v41  ;;  %v1981_v29 = vld [vmem:[%s2841_s6] ss:$0 sm:$0xff] }
0x100c   :  { %1946 = vtanh.f32 %v1186_v44 }
0x1014   :  { %v1199_v39 = vpop.permute.xlu1 %1198 }
0x1015   :  { %vm1200_vm5 = vcmp.eq.s32.totalorder %v1199_v39, 1 }
0x1016   :  { %v1166_v53 = vpop.permute.xlu0 %1165  ;;  %v2746_v4 = vsel %vm1200_vm5, %v1221_v24, %v2705_v12 }
0x1017   :  { %v1945_v33 = vpop.eup %1944  ;;  %vm1167_vm6 = vcmp.eq.s32.totalorder %v1166_v53, 1 }
0x1018   :  { %1224 = vrot.lane.b32.xlu1 %v1945_v33, %s2103_s29  ;;  %v2751_v6 = vsel %vm1167_vm6, %v1186_v44, %v2712_v2 }
0x1019   :  { %v1947_v34 = vpop.eup %1946 }
0x101a   :  { %1189 = vrot.lane.b32.xlu0 %v1947_v34, %s2103_s29 }
0x108a   :  { %v1225_v61 = vpop.permute.xlu1 %1224 }
0x108b   :  { %v1227_v28 = vmul.f32 %v1941_v20, %v1225_v61 }
0x108c   :  { %v1190_v32 = vpop.permute.xlu0 %1189 }
0x108d   :  { %v2719_v38 = vsel %vm1200_vm5, %v1227_v28, %v2658_v51  ;;  %v1192_v57 = vmul.f32 %v1943_v43, %v1190_v32 }
0x108e   :  { %1231 = vrot.lane.b32.xlu0 %v2719_v38, %s2106_s14 }
0x108f   :  { %v2725_v54 = vsel %vm1167_vm6, %v1192_v57, %v2666_v1 }
0x1090   :  { %1235 = vrot.lane.b32.xlu1 %v2725_v54, %s2107_s15 }
0x1100   :  { %v1232_v58 = vpop.permute.xlu0 %1231 }
0x1102   :  { %v1236_v50 = vpop.permute.xlu1 %1235 }
0x1103   :  { %v1238_v56 = vsel %vm87_vm0, %v1232_v58, %v1236_v50  ;;  %v1982_v58 = vld [vmem:[%s2836_s1] sm:$0xff] }
0x1104   :  { %1765 = vmatmul.mubr.msk.f32.vlgmr.msra.gmra.mxu1 %vm288_vm2, %v1238_v56 }
0x11c4   :  { %v1308_v52 = vpop.f32.mrf.mxu1 }
0x11c5   :  { %v1359_v60 = vadd.f32 %v1308_v52, %v262_v37 }
0x11c6   :  { %v1310_v30 = vpop.f32.mrf.mxu1 }
0x11c7   :  { %1948 = vtanh.f32 %v1359_v60  ;;  %v1324_v55 = vadd.f32 %v2298_v31, %v1310_v30  ;;  %v1767_v23 = vmul.f32 -1.442695, %v1359_v60 }
0x11c9   :  { %1950 = vtanh.f32 %v1324_v55  ;;  %v1766_v48 = vmul.f32 -1.442695, %v1324_v55 }
0x11ca   :  { %1952 = vpow2.f32 %v1767_v23 }
0x11cb   :  { %1954 = vpow2.f32 %v1766_v48 }
0x11d4   :  { %v1949_v25 = vpop.eup %1948 }
0x11d5   :  { %1369 = vrot.lane.b32.xlu1 %v1949_v25, %s2103_s29 }
0x11d6   :  { %v1951_v40 = vpop.eup %1950 }
0x11d7   :  { %1334 = vrot.lane.b32.xlu0 %v1951_v40, %s2103_s29  ;;  %v1953_v63 = vpop.eup %1952 }
0x11d8   :  { %v1955_v51 = vpop.eup %1954  ;;  %v1363_v27 = vadd.f32 1.0, %v1953_v63 }
0x11d9   :  { %v1328_v47 = vadd.f32 1.0, %v1955_v51 }
0x11da   :  { %1956 = vrcp.f32 %v1363_v27 }
0x11db   :  { %1958 = vrcp.f32 %v1328_v47 }
0x11e7   :  { %v1957_v26 = vpop.eup %1956 }
0x11e8   :  { %v1959_v36 = vpop.eup %1958  ;;  %v1367_v46 = vmul.f32 %v1957_v26, %v2746_v4 }
0x11e9   :  { %v1332_v9 = vmul.f32 %v1959_v36, %v2751_v6 }
0x1247   :  { %v1370_v1 = vpop.permute.xlu1 %1369 }
0x1248   :  { %v1372_v31 = vmul.f32 %v1957_v26, %v1370_v1 }
0x1249   :  { %v1335_v59 = vpop.permute.xlu0 %1334 }
0x124a   :  { %1374 = vrot.lane.b32.xlu1 %v1372_v31, %s2103_s29  ;;  %v1337_v7 = vmul.f32 %v1959_v36, %v1335_v59 }
0x124c   :  { %1339 = vrot.lane.b32.xlu0 %v1337_v7, %s2103_s29 }
0x124e   :  { %1354 = vperm.xlu1 %1850, %v2739_v3  }
0x1250   :  { %1321 = vperm.xlu0 %1851, %v2696_v10  }
0x12bc   :  { %v1375_v5 = vpop.permute.xlu1 %1374 }
0x12bd   :  { %v2753_v8 = vadd.f32 %v1375_v5, %v1367_v46 }
0x12be   :  { %v1340_v11 = vpop.permute.xlu0 %1339 }
0x12bf   :  { %1960 = vtanh.f32 %v2753_v8  ;;  %v1342_v13 = vadd.f32 %v1340_v11, %v1332_v9 }
0x12c1   :  { %1962 = vtanh.f32 %v1342_v13 }
0x12c9   :  { %v1355_v17 = vpop.permute.xlu1 %1354 }
0x12ca   :  { %vm1356_vm8 = vcmp.eq.s32.totalorder %v1355_v17, 1 }
0x12cb   :  { %v1322_v18 = vpop.permute.xlu0 %1321  ;;  %v1385_v60 = vsel %vm1356_vm8, %v2753_v8, %v2746_v4 }
0x12cc   :  { %v1961_v15 = vpop.eup %1960  ;;  %vm1323_vm9 = vcmp.eq.s32.totalorder %v1322_v18, 1 }
0x12cd   :  { %1380 = vrot.lane.b32.xlu1 %v1961_v15, %s2103_s29  ;;  %v1350_v25 = vsel %vm1323_vm9, %v1342_v13, %v2751_v6 }
0x12ce   :  { %v1963_v16 = vpop.eup %1962 }
0x12cf   :  { %1345 = vrot.lane.b32.xlu0 %v1963_v16, %s2103_s29 }
0x133f   :  { %v1381_v19 = vpop.permute.xlu1 %1380 }
0x1340   :  { %v1383_v20 = vmul.f32 %v1957_v26, %v1381_v19 }
0x1341   :  { %v1346_v21 = vpop.permute.xlu0 %1345 }
0x1342   :  { %v2761_v22 = vsel %vm1356_vm8, %v1383_v20, %v2719_v38  ;;  %v1348_v43 = vmul.f32 %v1959_v36, %v1346_v21 }
0x1343   :  { %1387 = vrot.lane.b32.xlu0 %v2761_v22, %s2106_s14 }
0x1344   :  { %v2767_v62 = vsel %vm1323_vm9, %v1348_v43, %v2725_v54 }
0x1345   :  { %1391 = vrot.lane.b32.xlu1 %v2767_v62, %s2107_s15 }
0x13b5   :  { %v1388_v49 = vpop.permute.xlu0 %1387 }
0x13b7   :  { %v1392_v10 = vpop.permute.xlu1 %1391 }
0x13b8   :  { %v1394_v12 = vsel %vm87_vm0, %v1388_v49, %v1392_v10 }
0x13b9   :  { %1768 = vmatmul.mubr.msk.f32.vlgmr.msra.gmra.mxu0 %vm288_vm2, %v1394_v12  ;;  %vm1507_vm2 = vcmp.gt.s32.totalorder %v1982_v58, 7 }
0x13ba   :  { %v1508_v52 = vsel %vm1507_vm2, 1, %v2105_v35 }
0x1479   :  { %v1464_v2 = vpop.f32.mrf.mxu0 }
0x147a   :  { %v1515_v24 = vadd.f32 %v1464_v2, %v267_v14 }
0x147b   :  { %v1466_v41 = vpop.f32.mrf.mxu0 }
0x147c   :  { %1964 = vtanh.f32 %v1515_v24  ;;  %v1480_v44 = vadd.f32 %v1981_v29, %v1466_v41  ;;  %v1770_v39 = vmul.f32 -1.442695, %v1515_v24 }
0x147e   :  { %1966 = vtanh.f32 %v1480_v44  ;;  %v1769_v53 = vmul.f32 -1.442695, %v1480_v44 }
0x147f   :  { %1968 = vpow2.f32 %v1770_v39 }
0x1480   :  { %1970 = vpow2.f32 %v1769_v53 }
0x1489   :  { %v1965_v33 = vpop.eup %1964 }
0x148a   :  { %1525 = vrot.lane.b32.xlu1 %v1965_v33, %s2103_s29 }
0x148b   :  { %v1967_v34 = vpop.eup %1966 }
0x148c   :  { %1490 = vrot.lane.b32.xlu0 %v1967_v34, %s2103_s29  ;;  %v1969_v45 = vpop.eup %1968 }
0x148d   :  { %v1971_v61 = vpop.eup %1970  ;;  %v1519_v28 = vadd.f32 1.0, %v1969_v45 }
0x148e   :  { %v1484_v32 = vadd.f32 1.0, %v1971_v61 }
0x148f   :  { %1972 = vrcp.f32 %v1519_v28 }
0x1490   :  { %1974 = vrcp.f32 %v1484_v32 }
0x149c   :  { %v1973_v38 = vpop.eup %1972 }
0x149d   :  { %v1975_v50 = vpop.eup %1974  ;;  %v1523_v30 = vmul.f32 %v1973_v38, %v1385_v60 }
0x149e   :  { %v1488_v23 = vmul.f32 %v1975_v50, %v1350_v25 }
0x14fc   :  { %v1526_v57 = vpop.permute.xlu1 %1525 }
0x14fd   :  { %v1528_v54 = vmul.f32 %v1973_v38, %v1526_v57 }
0x14fe   :  { %v1491_v56 = vpop.permute.xlu0 %1490 }
0x14ff   :  { %1530 = vrot.lane.b32.xlu1 %v1528_v54, %s2103_s29  ;;  %v1493_v37 = vmul.f32 %v1975_v50, %v1491_v56 }
0x1501   :  { %1495 = vrot.lane.b32.xlu0 %v1493_v37, %s2103_s29 }
0x1503   :  { %1510 = vperm.xlu1 %1850, %v1508_v52  }
0x1505   :  { %1477 = vperm.xlu0 %1851, %v2739_v3  }
0x1571   :  { %v1531_v55 = vpop.permute.xlu1 %1530 }
0x1572   :  { %v1533_v40 = vadd.f32 %v1531_v55, %v1523_v30 }
0x1573   :  { %v1496_v48 = vpop.permute.xlu0 %1495 }
0x1574   :  { %1976 = vtanh.f32 %v1533_v40  ;;  %v1498_v63 = vadd.f32 %v1496_v48, %v1488_v23 }
0x1576   :  { %1978 = vtanh.f32 %v1498_v63 }
0x157e   :  { %v1511_v35 = vpop.permute.xlu1 %1510 }
0x157f   :  { %vm1512_vm10 = vcmp.eq.s32.totalorder %v1511_v35, 1 }
0x1580   :  { %v1478_v27 = vpop.permute.xlu0 %1477  ;;  %v1541_v26 = vsel %vm1512_vm10, %v1533_v40, %v1385_v60 }
0x1581   :  { %v1977_v51 = vpop.eup %1976  ;;  %vm1479_vm11 = vcmp.eq.s32.totalorder %v1478_v27, 1 }
0x1582   :  { %1536 = vrot.lane.b32.xlu1 %v1977_v51, %s2103_s29  ;;  %v1506_v1 = vsel %vm1479_vm11, %v1498_v63, %v1350_v25 }
0x1583   :  { %v1979_v47 = vpop.eup %1978 }
0x1584   :  { %1501 = vrot.lane.b32.xlu0 %v1979_v47, %s2103_s29 }
0x1586   :  { %1548 = vrot.lane.b32.xlu1 %v1541_v26, %s2107_s15 }
0x158a   :  { %1558 = vrot.lane.b32.xlu1 %v1506_v1, %s2107_s15 }
0x15f4   :  { %v1537_v31 = vpop.permute.xlu1 %1536 }
0x15f5   :  { %v1539_v36 = vmul.f32 %v1973_v38, %v1537_v31 }
0x15f6   :  { %v1502_v59 = vpop.permute.xlu0 %1501 }
0x15f7   :  { %v1540_v7 = vsel %vm1512_vm10, %v1539_v36, %v2761_v22  ;;  %v1504_v3 = vmul.f32 %v1975_v50, %v1502_v59 }
0x15f8   :  { %v1549_v4 = vpop.permute.xlu1 %1548  ;;  %1543 = vrot.lane.b32.xlu0 %v1540_v7, %s2106_s14 }
0x15f9   :  { %1551 = vst.msk [vmem:[#allocation4] sm:$0xff] %vm87_vm0, %v1549_v4  ;;  %v1505_v46 = vsel %vm1479_vm11, %v1504_v3, %v2767_v62 }
0x15fc   :  { %v1559_v5 = vpop.permute.xlu1 %1558  ;;  %1553 = vrot.lane.b32.xlu0 %v1505_v46, %s2106_s14 }
0x15fd   :  { %1561 = vst.msk [vmem:[#allocation6] sm:$0xff] %vm87_vm0, %v1559_v5 }
0x166a   :  { %v1544_v6 = vpop.permute.xlu0 %1543 }
0x166b   :  { %1546 = vst.msk [vmem:[#allocation3] sm:$0xff] %vm87_vm0, %v1544_v6 }
0x166e   :  { %v1554_v8 = vpop.permute.xlu0 %1553 }
0x166f   :  { %1556 = vst.msk [vmem:[#allocation5] sm:$0xff] %vm87_vm0, %v1554_v8 }
0x1670 PF:  { %1812 = vmatprep.subr.mxu0 %v2102_v0  ;;  %v1585_v11 = vld [vmem:[#allocation14 + $0x78] sm:$0xff]  ;;  %v1584_v13 = vld [vmem:[#allocation14 + $0x68] sm:$0xff]  ;;  %s2108_s3 = smov 32   ;;  %vm2109_vm12 = vmmov 0   ;;  %vm1601_vm13 = vcmask 523264   ;;  %s1771_s23 = sld [smem:[#allocation8 + $0x1]] }
0x1671   :  { %1813 = vmatpush3.msra.mxu0 %v1585_v11  ;;  %v1583_v15 = vld [vmem:[#allocation14 + $0x58] sm:$0xff]  ;;  %1828 = vmatprep.mubr.msk.f32.mxu0 %vm2109_vm12, %v2102_v0  ;;  %v1675_v16 = vld [vmem:[#allocation6] sm:$0xff]  ;;  %v1773_v49 = vld [vmem:[%s2841_s6] ss:$0 sm:$0xff]  ;;  %v2110_v29 = vmov 0   ;;  %s2112_s27 = smov [#allocation15]  }
0x1672   :  { %1814 = vmatprep.subr.mxu0 %v2102_v0  ;;  %v1582_v17 = vld [vmem:[#allocation14 + $0x48] sm:$0xff]  ;;  %1684 = vrot.lane.b32.xlu1 %v1675_v16, %s2108_s3  ;;  %v1581_v18 = vld [vmem:[#allocation14 + $0x38] sm:$0xff]  ;;  %v1586_v22 = vld [vmem:[#allocation3] sm:$0xff]  ;;  %s1719_s28 = sshll.u32 %s2112_s27, 4  ;;  %s1720_s28 = int_to_ptr.vmem [resolvable:$true] %s1719_s28 }
0x1673   :  { %1815 = vmatpush3.msra.mxu0 %v1584_v13  ;;  %v1580_v19 = vld [vmem:[#allocation14 + $0x28] sm:$0xff]  ;;  %v1579_v20 = vld [vmem:[#allocation14 + $0x18] sm:$0xff]  ;;  %v1565_v41 = vld [vmem:[%s2836_s1] sm:$0xff]  ;;  %1983 = vset.pattern.permute.xlu0 %v2110_v29  ;;  %s2111_s1 = smov 64   ;;  %s2066_s30 = scalar_lea.vmem %s1720_s28, 128 }
0x1674   :  { %1816 = vmatprep.subr.mxu0 %v2102_v0  ;;  %v1578_v21 = vld [vmem:[#allocation14 + $0x8] sm:$0xff]  ;;  %vm1571_vm14 = vcmp.gt.s32.totalorder %v1565_v41, 0  ;;  %p2067_p13 = scmp.ne.s32.totalorder %s1720_s28, %s2066_s30  ;;  %p2071_p0 = scmp.lt.s32.totalorder %s1720_s28, %s1720_s28 }
0x1675   :  { %1817 = vmatpush3.msra.mxu0 %v1583_v15  ;;  %p2072_p1 = scmp.lt.s32.totalorder %s2066_s30, %s2066_s30 }
0x1676   :  { %v2806_v9 = vld [vmem:[#allocation5] sm:$0xff]  ;;  %1818 = vmatprep.subr.mxu0 %v2102_v0  ;;  %s1772_s6 = sshll.u32 %s1771_s23, 3 }
0x1677   :  { %1589 = vrot.lane.b32.xlu0 %v2806_v9, %s2108_s3  ;;  %1819 = vmatpush3.msra.mxu0 %v1582_v17  ;;  %s1568_s26 = sadd.s32 7, %s1772_s6  ;;  %p2073_p2 = por %p2072_p1, %p2071_p0 }
0x1678   :  { %1820 = vmatprep.subr.mxu0 %v2102_v0  ;;  %v1569_v44 = vstv %s1568_s26 }
0x1679   :  { %1821 = vmatpush3.msra.mxu0 %v1581_v18  ;;  %vm1570_vm15 = vcmp.gt.s32.totalorder %v1565_v41, %v1569_v44  ;;  %p2074_p3 = pnand %p2073_p2, %p2067_p13 }
0x167a   :  { %1822 = vmatprep.subr.mxu0 %v2102_v0  ;;  %vm1572_vm1 = vmand %vm1570_vm15, %vm1571_vm14 }
0x167b   :  { %1823 = vmatpush3.msra.mxu0 %v1580_v19  ;;  %v1573_v33 = vsel %vm1572_vm1, 1, %v2110_v29 }
0x167c   :  { %1824 = vmatprep.subr.mxu0 %v2102_v0 }
0x167d   :  { %1825 = vmatpush3.msra.mxu0 %v1579_v20 }
0x167e   :  { %1826 = vmatprep.subr.mxu0 %v2102_v0 }
0x167f   :  { %1827 = vmatpush3.msra.mxu0 %v1578_v21 }
0x16e4   :  { %v1685_v45 = vpop.permute.xlu1 %1684 }
0x16e9   :  { %v1590_v43 = vpop.permute.xlu0 %1589 }
0x16ea   :  { %v1593_v62 = vsel %vm87_vm0, %v1586_v22, %v1590_v43 }
0x16eb   :  { %1829 = vmatmul.mubr.msk.f32.vlgmr.msra.gmra.mxu0 %vm1601_vm13, %v1593_v62 }
0x17ab   :  { %v1671_v10 = vpop.f32.mrf.mxu0 }
0x17ac   :  { %v1672_v12 = vadd.f32 %v1773_v49, %v1671_v10 }
0x17ad   :  { %v1830_v42 = vpop.f32.mrf.mxu0 }
0x17ae   :  { %1984 = vtanh.f32 %v1672_v12  ;;  %v1775_v2 = vmul.f32 -1.442695, %v1672_v12 }
0x17b0   :  { %1986 = vpow2.f32 %v1775_v2 }
0x17bb   :  { %v1985_v14 = vpop.eup %1984 }
0x17bc   :  { %1689 = vrot.lane.b32.xlu0 %v1985_v14, %s2108_s3 }
0x17bd   :  { %v1987_v0 = vpop.eup %1986 }
0x17be   :  { %v1679_v24 = vadd.f32 1.0, %v1987_v0 }
0x17c0   :  { %1988 = vrcp.f32 %v1679_v24  ;;  %1575 = vperm.xlu0 %1983, %v1573_v33  }
0x17cd   :  { %v1989_v34 = vpop.eup %1988 }
0x17ce   :  { %v1687_v61 = vmul.f32 %v1989_v34, %v1685_v45 }
0x182e   :  { %v1690_v39 = vpop.permute.xlu0 %1689 }
0x182f   :  { %v1692_v53 = vmul.f32 %v1989_v34, %v1690_v39 }
0x1831   :  { %1694 = vrot.lane.b32.xlu1 %v1692_v53, %s2108_s3 }
0x183b   :  { %v1576_v57 = vpop.permute.xlu0 %1575 }
0x183c   :  { %vm1577_vm3 = vcmp.eq.s32.totalorder %v1576_v57, 1 }
0x18a3   :  { %v1695_v28 = vpop.permute.xlu1 %1694 }
0x18a4   :  { %v1697_v32 = vadd.f32 %v1695_v28, %v1687_v61 }
0x18a6   :  { %1990 = vtanh.f32 %v1697_v32 }
0x18b3   :  { %v1991_v38 = vpop.eup %1990 }
0x18b4   :  { %1700 = vrot.lane.b32.xlu1 %v1991_v38, %s2108_s3 }
0x18b8   :  { %1704 = vrot.lane.b32.xlu1 %v2806_v9, %s2111_s1 }
0x1926   :  { %v1701_v54 = vpop.permute.xlu1 %1700 }
0x1927   :  { %v1703_v58 = vmul.f32 %v1989_v34, %v1701_v54 }
0x192a   :  { %v1705_v50 = vpop.permute.xlu1 %1704 }
0x192b   :  { %v1707_v56 = vsel %vm1577_vm3, %v1703_v58, %v1705_v50 }
0x192c   :  { %1709 = vrot.lane.b32.xlu0 %v1707_v56, %s2111_s1 }
0x199e   :  { %v1710_v37 = vpop.permute.xlu0 %1709 }
0x199f   :  { %1712 = vst.msk [vmem:[#allocation15] sm:$0xff] %vm87_vm0, %v1710_v37 }
0x19a0   :  { %2077 = shalt.err (!%p2074_p3)
}
0x19a1   :  { %1722 = dma.vmem_to_hbm [thread:$0]  %s1720_s28, 128, %s2842_s7, [#allocation11]  }
0x19a2   :  { %2092 = dma.done.wait [#allocation11], 128  }
0x19a3   :  { %2093 = vsyncadd [#allocation11], 4294967168 }
0x19a4   :  { %1726 = vsyncpa [#allocation10], 1 }
0x19a5   :  { %1727 = vsyncpa [#allocation13], 1 }
0x19a6   :  { %1728 = vsyncpa [#allocation11], 1 }

</bundles_post_ra>
